<compile_context>
chip_gen: v7x
topology: tpu7x:2x2x1
jax: 0.10.0
libtpu: 0.0.40
codegen_flags: <defaults>
</compile_context>

<pallas_src>
import functools

import jax
import jax.numpy as jnp
from jax.experimental import pallas as pl
from jax.experimental.pallas import tpu as pltpu

NUM_CLASSES = 101
PAD_CLASSES = 128          # lane-dense classifier output; sliced to 101 outside
STEM_OUT = 16
FEAT_DIM = 1280
FBLK = 640                 # FEAT_DIM block per "parallel" grid slice (2 blocks)
FCHUNK = 128               # in-kernel lane-aligned FEAT_DIM chunk
FLOW_CH = 20               # 2L with L = 10


def _pick_ts_max():
    # Bigger S tiles on 128-MiB-VMEM chips (v5e/v6e); 1024 on v7x (64 MiB).
    try:
        vmem = pltpu.get_tpu_info().vmem_capacity_bytes
        return 2048 if vmem >= 100 * 1024 * 1024 else 1024
    except Exception:
        return 1024


TS_MAX = _pick_ts_max()


def _round_up(x, m):
    return (x + m - 1) // m * m


def _hardswish(x):
    return x * jnp.clip(x + 3.0, 0.0, 6.0) * (1.0 / 6.0)


# --------------------------------------------------------------------------
# Kernel A: stem conv (im2col matmul) + trunk surrogate + hardswish + GAP sum
#           + per-FEAT_DIM-block partial classifier logits in the epilogue.
# grid = (N, FEAT_DIM//FBLK, S_pad//ts); batch & feature axes "parallel",
# S axis "arbitrary" reduction.
# --------------------------------------------------------------------------
def _trunk_kernel(rgb_p_ref, flow_p_ref, w1r_ref, w1f_ref, w2_ref,
                  w3r_ref, w3f_ref, out_r_ref, out_f_ref, acc_r, acc_f,
                  *, inv_s, ts, fblk, chunk):
    s_idx = pl.program_id(2)

    @pl.when(s_idx == 0)
    def _():
        acc_r[...] = jnp.zeros_like(acc_r)
        acc_f[...] = jnp.zeros_like(acc_f)

    def accumulate(patches, w1_ref, acc):
        # stem conv as im2col matmul (bf16 operands, f32 accumulate) + hardswish
        h1 = _hardswish(jnp.dot(patches, w1_ref[...],
                                preferred_element_type=jnp.float32))
        h1 = h1.astype(jnp.bfloat16)
        # trunk surrogate 1x1 expansion (16 -> fblk), chunked over 128 lanes so
        # the live f32 intermediate stays (ts, 128) regardless of ts.
        for c in range(fblk // chunk):
            lo = c * chunk
            h2 = _hardswish(jnp.dot(h1, w2_ref[:, lo:lo + chunk],
                                    preferred_element_type=jnp.float32))
            # sublane-resident partial sums: (ts, chunk) -> (ts/8, 8, chunk) -> (8, chunk)
            acc[:, lo:lo + chunk] += jnp.sum(
                h2.reshape(ts // 8, 8, chunk), axis=0)

    accumulate(rgb_p_ref[0], w1r_ref, acc_r)
    accumulate(flow_p_ref[0], w1f_ref, acc_f)

    @pl.when(s_idx == pl.num_programs(2) - 1)
    def _():
        # 8-way cross-sublane reduce + 1/S scale -> GAP feature block (1, fblk)
        feat_r = jnp.sum(acc_r[...], axis=0, keepdims=True) * inv_s
        feat_f = jnp.sum(acc_f[...], axis=0, keepdims=True) * inv_s
        # partial classifier logits for this FEAT_DIM block (bias added later,
        # once, in the combine kernel).
        log_r = jnp.dot(feat_r.astype(jnp.bfloat16), w3r_ref[...],
                        preferred_element_type=jnp.float32)
        log_f = jnp.dot(feat_f.astype(jnp.bfloat16), w3f_ref[...],
                        preferred_element_type=jnp.float32)
        out_r_ref[...] = log_r.reshape(1, 1, 1, PAD_CLASSES)
        out_f_ref[...] = log_f.reshape(1, 1, 1, PAD_CLASSES)


# --------------------------------------------------------------------------
# Kernel B: tiny combine: sum partial logits over FEAT_DIM blocks, add bias,
#           softmax (approx reciprocal), (rgb + 2*flow)/3 fusion.
# --------------------------------------------------------------------------
def _head_kernel(pr_ref, pf_ref, b3r_ref, b3f_ref, out_ref):
    def softmax(logits):
        logits = logits - jnp.max(logits, axis=-1, keepdims=True)
        e = jnp.exp(logits)
        return e * pl.reciprocal(jnp.sum(e, axis=-1, keepdims=True), approx=True)

    logits_r = jnp.sum(pr_ref[...], axis=1) + b3r_ref[...]
    logits_f = jnp.sum(pf_ref[...], axis=1) + b3f_ref[...]
    out_ref[...] = (softmax(logits_r) + 2.0 * softmax(logits_f)) * (1.0 / 3.0)


def _im2col_3x3_s2(x_nchw):
    """NCHW -> (N, Ho*Wo, 9*C) patches for a 3x3 / stride-2 / pad-1 conv."""
    x = jnp.transpose(x_nchw, (0, 2, 3, 1))  # NHWC
    n, h, w, c = x.shape
    assert h % 2 == 0 and w % 2 == 0, "im2col path assumes even H, W"
    ho, wo = h // 2, w // 2
    xp = jnp.pad(x, ((0, 0), (1, 1), (1, 1), (0, 0)))
    cols = []
    for ky in range(3):
        for kx in range(3):
            cols.append(xp[:, ky:ky + h:2, kx:kx + w:2, :])  # (N, Ho, Wo, C)
    p = jnp.stack(cols, axis=3)  # (N, Ho, Wo, 9, C) in (ky, kx, c) order
    return p.reshape(n, ho * wo, 9 * c)


def init_params(key):
    k1, k2, k3, k4, k5, k6 = jax.random.split(key, 6)
    # rgb stem conv, PyTorch OIHW (16, 3, 3, 3) -> HWIO (3, 3, 3, 16)
    stem_oihw = 0.1 * jax.random.normal(k1, (STEM_OUT, 3, 3, 3), jnp.float32)
    w1_rgb_hwio = jnp.transpose(stem_oihw, (2, 3, 1, 0))           # (3,3,3,16)
    # flow stem: mean over rgb in-channels.  (Replication across 20 channels is
    # folded into the wrapper's channel-sum of the flow input -> exact.)
    w1_flow_mean = jnp.mean(w1_rgb_hwio, axis=2)                   # (3,3,16)
    # trunk surrogate (shared by both "pretrained" backbones)
    w2 = 0.05 * jax.random.normal(k2, (STEM_OUT, FEAT_DIM), jnp.float32)
    # per-stream fresh classifier Linear(1280, 101) (weight stored transposed)
    bound = 1.0 / jnp.sqrt(jnp.float32(FEAT_DIM))
    w3_rgb = jax.random.uniform(k3, (FEAT_DIM, NUM_CLASSES), jnp.float32, -bound, bound)
    b3_rgb = jax.random.uniform(k4, (1, NUM_CLASSES), jnp.float32, -bound, bound)
    w3_flow = jax.random.uniform(k5, (FEAT_DIM, NUM_CLASSES), jnp.float32, -bound, bound)
    b3_flow = jax.random.uniform(k6, (1, NUM_CLASSES), jnp.float32, -bound, bound)
    return dict(
        w1_rgb=w1_rgb_hwio.reshape(9 * 3, STEM_OUT),
        w1_flow=w1_flow_mean.reshape(9, STEM_OUT),
        w2=w2, w3_rgb=w3_rgb, b3_rgb=b3_rgb, w3_flow=w3_flow, b3_flow=b3_flow,
    )


@jax.jit
def two_stream_fall_net(rgb, flow, params):
    """rgb: N x 3 x H x W, flow: N x 20 x H x W (NCHW, float32)."""
    n = rgb.shape[0]
    # Flow stem weight is the per-output mean over RGB channels replicated over
    # all 20 flow channels  =>  conv(flow, w_flow) == conv(sum_c flow, w_mean).
    flow_sum = jnp.sum(flow, axis=1, keepdims=True)                # (N,1,H,W)

    # bf16 BEFORE im2col: the (N,S,27)/(N,S,9) patch tensors are materialized
    # once in bf16 (halves the XLA-side HBM traffic of the im2col).
    rgb_p = _im2col_3x3_s2(rgb.astype(jnp.bfloat16))      # (N, S, 27)
    flow_p = _im2col_3x3_s2(flow_sum.astype(jnp.bfloat16))  # (N, S, 9)
    s = rgb_p.shape[1]

    # S tile: as large as allowed while minimizing padding (no ~2x pad blow-up).
    n_tiles = -(-s // TS_MAX)
    ts = _round_up(-(-s // n_tiles), 16)
    s_pad = n_tiles * ts
    if s_pad != s:
        # zero rows contribute exactly 0 through hardswish (no biases in trunk)
        pad = ((0, 0), (0, s_pad - s), (0, 0))
        rgb_p = jnp.pad(rgb_p, pad)
        flow_p = jnp.pad(flow_p, pad)

    w1r = params["w1_rgb"].astype(jnp.bfloat16)
    w1f = params["w1_flow"].astype(jnp.bfloat16)
    w2 = params["w2"].astype(jnp.bfloat16)
    # Classifier padded to a lane-dense 128-class tile (bf16 weights, f32 bias);
    # padded classes get bias -1e30 so they receive exactly zero probability.
    pad_c = PAD_CLASSES - NUM_CLASSES
    w3r = jnp.pad(params["w3_rgb"], ((0, 0), (0, pad_c))).astype(jnp.bfloat16)
    w3f = jnp.pad(params["w3_flow"], ((0, 0), (0, pad_c))).astype(jnp.bfloat16)
    b3r = jnp.pad(params["b3_rgb"], ((0, 0), (0, pad_c)), constant_values=-1e30)
    b3f = jnp.pad(params["b3_flow"], ((0, 0), (0, pad_c)), constant_values=-1e30)

    kr, kf = rgb_p.shape[-1], flow_p.shape[-1]
    nf = FEAT_DIM // FBLK

    trunk = functools.partial(_trunk_kernel, inv_s=1.0 / s, ts=ts,
                              fblk=FBLK, chunk=FCHUNK)
    part_r, part_f = pl.pallas_call(
        trunk,
        out_shape=(jax.ShapeDtypeStruct((n, nf, 1, PAD_CLASSES), jnp.float32),
                   jax.ShapeDtypeStruct((n, nf, 1, PAD_CLASSES), jnp.float32)),
        grid=(n, nf, s_pad // ts),
        in_specs=[
            pl.BlockSpec((1, ts, kr), lambda b, f, t: (b, t, 0)),
            pl.BlockSpec((1, ts, kf), lambda b, f, t: (b, t, 0)),
            pl.BlockSpec((kr, STEM_OUT), lambda b, f, t: (0, 0)),
            pl.BlockSpec((kf, STEM_OUT), lambda b, f, t: (0, 0)),
            pl.BlockSpec((STEM_OUT, FBLK), lambda b, f, t: (0, f)),
            pl.BlockSpec((FBLK, PAD_CLASSES), lambda b, f, t: (f, 0)),
            pl.BlockSpec((FBLK, PAD_CLASSES), lambda b, f, t: (f, 0)),
        ],
        out_specs=(
            pl.BlockSpec((1, 1, 1, PAD_CLASSES), lambda b, f, t: (b, f, 0, 0)),
            pl.BlockSpec((1, 1, 1, PAD_CLASSES), lambda b, f, t: (b, f, 0, 0)),
        ),
        scratch_shapes=[pltpu.VMEM((8, FBLK), jnp.float32),
                        pltpu.VMEM((8, FBLK), jnp.float32)],
        compiler_params=pltpu.CompilerParams(
            dimension_semantics=("parallel", "parallel", "arbitrary"),
            vmem_limit_bytes=32 * 1024 * 1024),
    )(rgb_p, flow_p, w1r, w1f, w2, w3r, w3f)

    part_r = part_r.reshape(n, nf, PAD_CLASSES)
    part_f = part_f.reshape(n, nf, PAD_CLASSES)

    out = pl.pallas_call(
        _head_kernel,
        out_shape=jax.ShapeDtypeStruct((n, PAD_CLASSES), jnp.float32),
        grid=(1,),
        in_specs=[
            pl.BlockSpec((n, nf, PAD_CLASSES), lambda i: (0, 0, 0)),
            pl.BlockSpec((n, nf, PAD_CLASSES), lambda i: (0, 0, 0)),
            pl.BlockSpec((1, PAD_CLASSES), lambda i: (0, 0)),
            pl.BlockSpec((1, PAD_CLASSES), lambda i: (0, 0)),
        ],
        out_specs=pl.BlockSpec((n, PAD_CLASSES), lambda i: (0, 0)),
        compiler_params=pltpu.CompilerParams(
            dimension_semantics=("arbitrary",)),
    )(part_r, part_f, b3r, b3f)

    return out[:, :NUM_CLASSES]


def _reference(rgb, flow, params):
    """Pure-JAX f32 reference of the same forward (for a tolerance check)."""
    flow_sum = jnp.sum(flow, axis=1, keepdims=True)
    rgb_p = _im2col_3x3_s2(rgb)
    flow_p = _im2col_3x3_s2(flow_sum)

    def stream(p, w1, w3, b3):
        h1 = _hardswish(p @ w1)
        h2 = _hardswish(h1 @ params["w2"])
        feat = jnp.mean(h2, axis=1)
        return jax.nn.softmax(feat @ w3 + b3, axis=-1)

    sm_r = stream(rgb_p, params["w1_rgb"], params["w3_rgb"], params["b3_rgb"])
    sm_f = stream(flow_p, params["w1_flow"], params["w3_flow"], params["b3_flow"])
    return (sm_r + 2.0 * sm_f) / 3.0


if __name__ == "__main__":
    key = jax.random.PRNGKey(0)
    kp, kr_, kf_ = jax.random.split(key, 3)
    N, H, W = 2, 16, 16
    params = init_params(kp)
    rgb = jax.random.normal(kr_, (N, 3, H, W), jnp.float32)
    flow = jax.random.normal(kf_, (N, FLOW_CH, H, W), jnp.float32)

    out = two_stream_fall_net(rgb, flow, params)
    out = jax.block_until_ready(out)

    # Each row is (softmax + 2*softmax)/3 -> must sum to 1 (bf16 matmuls +
    # approx reciprocal => slightly looser tolerance than pure f32).
    assert out.shape == (N, NUM_CLASSES)
    row_sums = jnp.sum(out, axis=-1)
    assert bool(jnp.all(jnp.abs(row_sums - 1.0) < 2e-3)), row_sums

    ref = _reference(rgb, flow, params)
    assert bool(jnp.max(jnp.abs(out - ref)) < 1e-3), jnp.max(jnp.abs(out - ref))
    print("KERNEL_OK")
</pallas_src>

<mosaic_0001>
module attributes {stable_mosaic.version = 11 : i64} {
  func.func @_head_kernel(%arg0: i32, %arg1: memref<2x2x128xf32, #tpu.memory_space<vmem>>, %arg2: memref<2x2x128xf32, #tpu.memory_space<vmem>>, %arg3: memref<1x128xf32, #tpu.memory_space<vmem>>, %arg4: memref<1x128xf32, #tpu.memory_space<vmem>>, %arg5: memref<2x128xf32, #tpu.memory_space<vmem>>) attributes {dimension_semantics = [#tpu.dimension_semantics<arbitrary>], iteration_bounds = array<i64: 1>, scalar_prefetch = 0 : i64, scratch_operands = 0 : i64, tpu.core_type = #tpu.core_type<tc>, window_params = [{pipeline_mode = #tpu.pipeline_mode<synchronous>, transform_indices = @transform_0, window_bounds = array<i64: 2, 2, 128>}, {pipeline_mode = #tpu.pipeline_mode<synchronous>, transform_indices = @transform_1, window_bounds = array<i64: 2, 2, 128>}, {pipeline_mode = #tpu.pipeline_mode<synchronous>, transform_indices = @transform_2, window_bounds = array<i64: 1, 128>}, {pipeline_mode = #tpu.pipeline_mode<synchronous>, transform_indices = @transform_3, window_bounds = array<i64: 1, 128>}, {pipeline_mode = #tpu.pipeline_mode<synchronous>, transform_indices = @transform_4, window_bounds = array<i64: 2, 128>}]} {
    %c0 = arith.constant 0 : index
    %c0_0 = arith.constant 0 : index
    %c0_1 = arith.constant 0 : index
    %0 = vector.load %arg1[%c0, %c0_0, %c0_1] : memref<2x2x128xf32, #tpu.memory_space<vmem>>, vector<2x2x128xf32>
    %cst = arith.constant dense<0.000000e+00> : vector<2x128xf32>
    %1 = vector.multi_reduction <add>, %0, %cst [1] : vector<2x2x128xf32> to vector<2x128xf32>
    %c0_2 = arith.constant 0 : index
    %c0_3 = arith.constant 0 : index
    %2 = vector.load %arg3[%c0_2, %c0_3] : memref<1x128xf32, #tpu.memory_space<vmem>>, vector<1x128xf32>
    %3 = vector.broadcast %2 : vector<1x128xf32> to vector<2x128xf32>
    %4 = arith.addf %1, %3 : vector<2x128xf32>
    %c0_4 = arith.constant 0 : index
    %c0_5 = arith.constant 0 : index
    %c0_6 = arith.constant 0 : index
    %5 = vector.load %arg2[%c0_4, %c0_5, %c0_6] : memref<2x2x128xf32, #tpu.memory_space<vmem>>, vector<2x2x128xf32>
    %cst_7 = arith.constant dense<0.000000e+00> : vector<2x128xf32>
    %6 = vector.multi_reduction <add>, %5, %cst_7 [1] : vector<2x2x128xf32> to vector<2x128xf32>
    %c0_8 = arith.constant 0 : index
    %c0_9 = arith.constant 0 : index
    %7 = vector.load %arg4[%c0_8, %c0_9] : memref<1x128xf32, #tpu.memory_space<vmem>>, vector<1x128xf32>
    %8 = vector.broadcast %7 : vector<1x128xf32> to vector<2x128xf32>
    %9 = arith.addf %6, %8 : vector<2x128xf32>
    %cst_10 = arith.constant dense<0xFF800000> : vector<2xf32>
    %10 = vector.multi_reduction <maximumf>, %4, %cst_10 [1] : vector<2x128xf32> to vector<2xf32>
    %11 = vector.shape_cast %10 : vector<2xf32> to vector<2x1xf32>
    %12 = vector.broadcast %11 : vector<2x1xf32> to vector<2x128xf32>
    %13 = arith.subf %4, %12 : vector<2x128xf32>
    %14 = math.exp %13 : vector<2x128xf32>
    %cst_11 = arith.constant dense<0.000000e+00> : vector<2xf32>
    %15 = vector.multi_reduction <add>, %14, %cst_11 [1] : vector<2x128xf32> to vector<2xf32>
    %16 = vector.shape_cast %15 : vector<2xf32> to vector<2x1xf32>
    %17 = tpu.reciprocal %16 {approx = true} : vector<2x1xf32> -> vector<2x1xf32>
    %18 = vector.broadcast %17 : vector<2x1xf32> to vector<2x128xf32>
    %19 = arith.mulf %14, %18 : vector<2x128xf32>
    %cst_12 = arith.constant dense<0xFF800000> : vector<2xf32>
    %20 = vector.multi_reduction <maximumf>, %9, %cst_12 [1] : vector<2x128xf32> to vector<2xf32>
    %21 = vector.shape_cast %20 : vector<2xf32> to vector<2x1xf32>
    %22 = vector.broadcast %21 : vector<2x1xf32> to vector<2x128xf32>
    %23 = arith.subf %9, %22 : vector<2x128xf32>
    %24 = math.exp %23 : vector<2x128xf32>
    %cst_13 = arith.constant dense<0.000000e+00> : vector<2xf32>
    %25 = vector.multi_reduction <add>, %24, %cst_13 [1] : vector<2x128xf32> to vector<2xf32>
    %26 = vector.shape_cast %25 : vector<2xf32> to vector<2x1xf32>
    %27 = tpu.reciprocal %26 {approx = true} : vector<2x1xf32> -> vector<2x1xf32>
    %28 = vector.broadcast %27 : vector<2x1xf32> to vector<2x128xf32>
    %29 = arith.mulf %24, %28 : vector<2x128xf32>
    %cst_14 = arith.constant 2.000000e+00 : f32
    %30 = vector.broadcast %cst_14 : f32 to vector<2x128xf32>
    %31 = arith.mulf %30, %29 : vector<2x128xf32>
    %32 = arith.addf %19, %31 : vector<2x128xf32>
    %cst_15 = arith.constant 0.333333343 : f32
    %33 = vector.broadcast %cst_15 : f32 to vector<2x128xf32>
    %34 = arith.mulf %32, %33 : vector<2x128xf32>
    %c0_16 = arith.constant 0 : index
    %c0_17 = arith.constant 0 : index
    %35 = vector.load %arg5[%c0_16, %c0_17] : memref<2x128xf32, #tpu.memory_space<vmem>>, vector<2x128xf32>
    tpu.vector_store %arg5[%c0_16, %c0_17], %34 {strides = array<i32>} : memref<2x128xf32, #tpu.memory_space<vmem>>, vector<2x128xf32>,
    return
  }
  func.func @transform_0(%arg0: i32) -> (i32, i32, i32) {
    %c0_i32 = arith.constant 0 : i32
    %c0_i32_0 = arith.constant 0 : i32
    %c0_i32_1 = arith.constant 0 : i32
    %c0_i32_2 = arith.constant 0 : i32
    return %c0_i32, %c0_i32_0, %c0_i32_1 : i32, i32, i32
  }
  func.func @transform_1(%arg0: i32) -> (i32, i32, i32) {
    %c0_i32 = arith.constant 0 : i32
    %c0_i32_0 = arith.constant 0 : i32
    %c0_i32_1 = arith.constant 0 : i32
    %c0_i32_2 = arith.constant 0 : i32
    return %c0_i32, %c0_i32_0, %c0_i32_1 : i32, i32, i32
  }
  func.func @transform_2(%arg0: i32) -> (i32, i32) {
    %c0_i32 = arith.constant 0 : i32
    %c0_i32_0 = arith.constant 0 : i32
    %c0_i32_1 = arith.constant 0 : i32
    return %c0_i32, %c0_i32_0 : i32, i32
  }
  func.func @transform_3(%arg0: i32) -> (i32, i32) {
    %c0_i32 = arith.constant 0 : i32
    %c0_i32_0 = arith.constant 0 : i32
    %c0_i32_1 = arith.constant 0 : i32
    return %c0_i32, %c0_i32_0 : i32, i32
  }
  func.func @transform_4(%arg0: i32) -> (i32, i32) {
    %c0_i32 = arith.constant 0 : i32
    %c0_i32_0 = arith.constant 0 : i32
    %c0_i32_1 = arith.constant 0 : i32
    return %c0_i32, %c0_i32_0 : i32, i32
  }
}

module attributes {stable_mosaic.version = 11 : i64} {
  func.func @_trunk_kernel(%arg0: i32, %arg1: i32, %arg2: i32, %arg3: memref<1x64x27xbf16, #tpu.memory_space<vmem>>, %arg4: memref<1x64x9xbf16, #tpu.memory_space<vmem>>, %arg5: memref<27x16xbf16, #tpu.memory_space<vmem>>, %arg6: memref<9x16xbf16, #tpu.memory_space<vmem>>, %arg7: memref<16x640xbf16, #tpu.memory_space<vmem>>, %arg8: memref<640x128xbf16, #tpu.memory_space<vmem>>, %arg9: memref<640x128xbf16, #tpu.memory_space<vmem>>, %arg10: memref<1x1x1x128xf32, #tpu.memory_space<vmem>>, %arg11: memref<1x1x1x128xf32, #tpu.memory_space<vmem>>, %arg12: memref<8x640xf32, #tpu.memory_space<vmem>>, %arg13: memref<8x640xf32, #tpu.memory_space<vmem>>) attributes {dimension_semantics = [#tpu.dimension_semantics<parallel>, #tpu.dimension_semantics<parallel>, #tpu.dimension_semantics<arbitrary>], iteration_bounds = array<i64: 2, 2, 1>, scalar_prefetch = 0 : i64, scratch_operands = 2 : i64, tpu.core_type = #tpu.core_type<tc>, window_params = [{transform_indices = @transform_0, window_bounds = array<i64: 1, 64, 27>}, {transform_indices = @transform_1, window_bounds = array<i64: 1, 64, 9>}, {pipeline_mode = #tpu.pipeline_mode<synchronous>, transform_indices = @transform_2, window_bounds = array<i64: 27, 16>}, {pipeline_mode = #tpu.pipeline_mode<synchronous>, transform_indices = @transform_3, window_bounds = array<i64: 9, 16>}, {transform_indices = @transform_4, window_bounds = array<i64: 16, 640>}, {transform_indices = @transform_5, window_bounds = array<i64: 640, 128>}, {transform_indices = @transform_6, window_bounds = array<i64: 640, 128>}, {transform_indices = @transform_7, window_bounds = array<i64: 1, 1, 1, 128>}, {transform_indices = @transform_8, window_bounds = array<i64: 1, 1, 1, 128>}]} {
    %c0_i32 = arith.constant 0 : i32
    %0 = arith.cmpi eq, %arg2, %c0_i32 : i32
    %1 = arith.extui %0 : i1 to i32
    %c0_i32_0 = arith.constant 0 : i32
    %2 = arith.cmpi ne, %1, %c0_i32_0 : i32
    scf.if %2 {
      %cst_137 = arith.constant 0.000000e+00 : f32
      %194 = vector.broadcast %cst_137 : f32 to vector<8x640xf32>
      %c0_138 = arith.constant 0 : index
      %c0_139 = arith.constant 0 : index
      %195 = vector.load %arg12[%c0_138, %c0_139] : memref<8x640xf32, #tpu.memory_space<vmem>>, vector<8x640xf32>
      tpu.vector_store %arg12[%c0_138, %c0_139], %194 {strides = array<i32>} : memref<8x640xf32, #tpu.memory_space<vmem>>, vector<8x640xf32>,
      %cst_140 = arith.constant 0.000000e+00 : f32
      %196 = vector.broadcast %cst_140 : f32 to vector<8x640xf32>
      %c0_141 = arith.constant 0 : index
      %c0_142 = arith.constant 0 : index
      %197 = vector.load %arg13[%c0_141, %c0_142] : memref<8x640xf32, #tpu.memory_space<vmem>>, vector<8x640xf32>
      tpu.vector_store %arg13[%c0_141, %c0_142], %196 {strides = array<i32>} : memref<8x640xf32, #tpu.memory_space<vmem>>, vector<8x640xf32>,
    } else {
    }
    %c0 = arith.constant 0 : index
    %c0_1 = arith.constant 0 : index
    %c0_2 = arith.constant 0 : index
    %3 = vector.load %arg3[%c0, %c0_1, %c0_2] : memref<1x64x27xbf16, #tpu.memory_space<vmem>>, vector<1x64x27xbf16>
    %4 = vector.shape_cast %3 : vector<1x64x27xbf16> to vector<64x27xbf16>
    %c0_3 = arith.constant 0 : index
    %c0_4 = arith.constant 0 : index
    %5 = vector.load %arg5[%c0_3, %c0_4] : memref<27x16xbf16, #tpu.memory_space<vmem>>, vector<27x16xbf16>
    %cst = arith.constant dense<0.000000e+00> : vector<64x16xf32>
    %6 = tpu.matmul %4, %5, %cst {dimension_numbers = #tpu.dot_dimension_numbers<[1], [0], [0], [1], [0, 0, 1, 1], [], []>} : vector<64x27xbf16>, vector<27x16xbf16>, vector<64x16xf32> -> vector<64x16xf32>
    %cst_5 = arith.constant 3.000000e+00 : f32
    %7 = vector.broadcast %cst_5 : f32 to vector<64x16xf32>
    %8 = arith.addf %6, %7 : vector<64x16xf32>
    %cst_6 = arith.constant 0.000000e+00 : f32
    %cst_7 = arith.constant 6.000000e+00 : f32
    %9 = vector.broadcast %cst_6 : f32 to vector<64x16xf32>
    %10 = arith.maximumf %9, %8 : vector<64x16xf32>
    %11 = vector.broadcast %cst_7 : f32 to vector<64x16xf32>
    %12 = arith.minimumf %11, %10 : vector<64x16xf32>
    %13 = arith.mulf %6, %12 : vector<64x16xf32>
    %cst_8 = arith.constant 0.166666672 : f32
    %14 = vector.broadcast %cst_8 : f32 to vector<64x16xf32>
    %15 = arith.mulf %13, %14 : vector<64x16xf32>
    %16 = arith.truncf %15 : vector<64x16xf32> to vector<64x16xbf16>
    %c0_9 = arith.constant 0 : index
    %c0_10 = arith.constant 0 : index
    %17 = vector.load %arg7[%c0_9, %c0_10] : memref<16x640xbf16, #tpu.memory_space<vmem>>, vector<16x128xbf16>
    %cst_11 = arith.constant dense<0.000000e+00> : vector<64x128xf32>
    %18 = tpu.matmul %16, %17, %cst_11 {dimension_numbers = #tpu.dot_dimension_numbers<[1], [0], [0], [1], [0, 0, 1, 1], [], []>} : vector<64x16xbf16>, vector<16x128xbf16>, vector<64x128xf32> -> vector<64x128xf32>
    %cst_12 = arith.constant 3.000000e+00 : f32
    %19 = vector.broadcast %cst_12 : f32 to vector<64x128xf32>
    %20 = arith.addf %18, %19 : vector<64x128xf32>
    %cst_13 = arith.constant 0.000000e+00 : f32
    %cst_14 = arith.constant 6.000000e+00 : f32
    %21 = vector.broadcast %cst_13 : f32 to vector<64x128xf32>
    %22 = arith.maximumf %21, %20 : vector<64x128xf32>
    %23 = vector.broadcast %cst_14 : f32 to vector<64x128xf32>
    %24 = arith.minimumf %23, %22 : vector<64x128xf32>
    %25 = arith.mulf %18, %24 : vector<64x128xf32>
    %cst_15 = arith.constant 0.166666672 : f32
    %26 = vector.broadcast %cst_15 : f32 to vector<64x128xf32>
    %27 = arith.mulf %25, %26 : vector<64x128xf32>
    %c0_16 = arith.constant 0 : index
    %c0_17 = arith.constant 0 : index
    %28 = vector.load %arg12[%c0_16, %c0_17] : memref<8x640xf32, #tpu.memory_space<vmem>>, vector<8x128xf32>
    %29 = vector.shape_cast %27 : vector<64x128xf32> to vector<8x8x128xf32>
    %cst_18 = arith.constant dense<0.000000e+00> : vector<8x128xf32>
    %30 = vector.multi_reduction <add>, %29, %cst_18 [0] : vector<8x8x128xf32> to vector<8x128xf32>
    %31 = arith.addf %28, %30 : vector<8x128xf32>
    %c0_19 = arith.constant 0 : index
    %c0_20 = arith.constant 0 : index
    %32 = vector.load %arg12[%c0_19, %c0_20] : memref<8x640xf32, #tpu.memory_space<vmem>>, vector<8x128xf32>
    tpu.vector_store %arg12[%c0_19, %c0_20], %31 {strides = array<i32>} : memref<8x640xf32, #tpu.memory_space<vmem>>, vector<8x128xf32>,
    %c0_21 = arith.constant 0 : index
    %c128 = arith.constant 128 : index
    %33 = vector.load %arg7[%c0_21, %c128] : memref<16x640xbf16, #tpu.memory_space<vmem>>, vector<16x128xbf16>
    %cst_22 = arith.constant dense<0.000000e+00> : vector<64x128xf32>
    %34 = tpu.matmul %16, %33, %cst_22 {dimension_numbers = #tpu.dot_dimension_numbers<[1], [0], [0], [1], [0, 0, 1, 1], [], []>} : vector<64x16xbf16>, vector<16x128xbf16>, vector<64x128xf32> -> vector<64x128xf32>
    %cst_23 = arith.constant 3.000000e+00 : f32
    %35 = vector.broadcast %cst_23 : f32 to vector<64x128xf32>
    %36 = arith.addf %34, %35 : vector<64x128xf32>
    %cst_24 = arith.constant 0.000000e+00 : f32
    %cst_25 = arith.constant 6.000000e+00 : f32
    %37 = vector.broadcast %cst_24 : f32 to vector<64x128xf32>
    %38 = arith.maximumf %37, %36 : vector<64x128xf32>
    %39 = vector.broadcast %cst_25 : f32 to vector<64x128xf32>
    %40 = arith.minimumf %39, %38 : vector<64x128xf32>
    %41 = arith.mulf %34, %40 : vector<64x128xf32>
    %cst_26 = arith.constant 0.166666672 : f32
    %42 = vector.broadcast %cst_26 : f32 to vector<64x128xf32>
    %43 = arith.mulf %41, %42 : vector<64x128xf32>
    %c0_27 = arith.constant 0 : index
    %c128_28 = arith.constant 128 : index
    %44 = vector.load %arg12[%c0_27, %c128_28] : memref<8x640xf32, #tpu.memory_space<vmem>>, vector<8x128xf32>
    %45 = vector.shape_cast %43 : vector<64x128xf32> to vector<8x8x128xf32>
    %cst_29 = arith.constant dense<0.000000e+00> : vector<8x128xf32>
    %46 = vector.multi_reduction <add>, %45, %cst_29 [0] : vector<8x8x128xf32> to vector<8x128xf32>
    %47 = arith.addf %44, %46 : vector<8x128xf32>
    %c0_30 = arith.constant 0 : index
    %c128_31 = arith.constant 128 : index
    %48 = vector.load %arg12[%c0_30, %c128_31] : memref<8x640xf32, #tpu.memory_space<vmem>>, vector<8x128xf32>
    tpu.vector_store %arg12[%c0_30, %c128_31], %47 {strides = array<i32>} : memref<8x640xf32, #tpu.memory_space<vmem>>, vector<8x128xf32>,
    %c0_32 = arith.constant 0 : index
    %c256 = arith.constant 256 : index
    %49 = vector.load %arg7[%c0_32, %c256] : memref<16x640xbf16, #tpu.memory_space<vmem>>, vector<16x128xbf16>
    %cst_33 = arith.constant dense<0.000000e+00> : vector<64x128xf32>
    %50 = tpu.matmul %16, %49, %cst_33 {dimension_numbers = #tpu.dot_dimension_numbers<[1], [0], [0], [1], [0, 0, 1, 1], [], []>} : vector<64x16xbf16>, vector<16x128xbf16>, vector<64x128xf32> -> vector<64x128xf32>
    %cst_34 = arith.constant 3.000000e+00 : f32
    %51 = vector.broadcast %cst_34 : f32 to vector<64x128xf32>
    %52 = arith.addf %50, %51 : vector<64x128xf32>
    %cst_35 = arith.constant 0.000000e+00 : f32
    %cst_36 = arith.constant 6.000000e+00 : f32
    %53 = vector.broadcast %cst_35 : f32 to vector<64x128xf32>
    %54 = arith.maximumf %53, %52 : vector<64x128xf32>
    %55 = vector.broadcast %cst_36 : f32 to vector<64x128xf32>
    %56 = arith.minimumf %55, %54 : vector<64x128xf32>
    %57 = arith.mulf %50, %56 : vector<64x128xf32>
    %cst_37 = arith.constant 0.166666672 : f32
    %58 = vector.broadcast %cst_37 : f32 to vector<64x128xf32>
    %59 = arith.mulf %57, %58 : vector<64x128xf32>
    %c0_38 = arith.constant 0 : index
    %c256_39 = arith.constant 256 : index
    %60 = vector.load %arg12[%c0_38, %c256_39] : memref<8x640xf32, #tpu.memory_space<vmem>>, vector<8x128xf32>
    %61 = vector.shape_cast %59 : vector<64x128xf32> to vector<8x8x128xf32>
    %cst_40 = arith.constant dense<0.000000e+00> : vector<8x128xf32>
    %62 = vector.multi_reduction <add>, %61, %cst_40 [0] : vector<8x8x128xf32> to vector<8x128xf32>
    %63 = arith.addf %60, %62 : vector<8x128xf32>
    %c0_41 = arith.constant 0 : index
    %c256_42 = arith.constant 256 : index
    %64 = vector.load %arg12[%c0_41, %c256_42] : memref<8x640xf32, #tpu.memory_space<vmem>>, vector<8x128xf32>
    tpu.vector_store %arg12[%c0_41, %c256_42], %63 {strides = array<i32>} : memref<8x640xf32, #tpu.memory_space<vmem>>, vector<8x128xf32>,
    %c0_43 = arith.constant 0 : index
    %c384 = arith.constant 384 : index
    %65 = vector.load %arg7[%c0_43, %c384] : memref<16x640xbf16, #tpu.memory_space<vmem>>, vector<16x128xbf16>
    %cst_44 = arith.constant dense<0.000000e+00> : vector<64x128xf32>
    %66 = tpu.matmul %16, %65, %cst_44 {dimension_numbers = #tpu.dot_dimension_numbers<[1], [0], [0], [1], [0, 0, 1, 1], [], []>} : vector<64x16xbf16>, vector<16x128xbf16>, vector<64x128xf32> -> vector<64x128xf32>
    %cst_45 = arith.constant 3.000000e+00 : f32
    %67 = vector.broadcast %cst_45 : f32 to vector<64x128xf32>
    %68 = arith.addf %66, %67 : vector<64x128xf32>
    %cst_46 = arith.constant 0.000000e+00 : f32
    %cst_47 = arith.constant 6.000000e+00 : f32
    %69 = vector.broadcast %cst_46 : f32 to vector<64x128xf32>
    %70 = arith.maximumf %69, %68 : vector<64x128xf32>
    %71 = vector.broadcast %cst_47 : f32 to vector<64x128xf32>
    %72 = arith.minimumf %71, %70 : vector<64x128xf32>
    %73 = arith.mulf %66, %72 : vector<64x128xf32>
    %cst_48 = arith.constant 0.166666672 : f32
    %74 = vector.broadcast %cst_48 : f32 to vector<64x128xf32>
    %75 = arith.mulf %73, %74 : vector<64x128xf32>
    %c0_49 = arith.constant 0 : index
    %c384_50 = arith.constant 384 : index
    %76 = vector.load %arg12[%c0_49, %c384_50] : memref<8x640xf32, #tpu.memory_space<vmem>>, vector<8x128xf32>
    %77 = vector.shape_cast %75 : vector<64x128xf32> to vector<8x8x128xf32>
    %cst_51 = arith.constant dense<0.000000e+00> : vector<8x128xf32>
    %78 = vector.multi_reduction <add>, %77, %cst_51 [0] : vector<8x8x128xf32> to vector<8x128xf32>
    %79 = arith.addf %76, %78 : vector<8x128xf32>
    %c0_52 = arith.constant 0 : index
    %c384_53 = arith.constant 384 : index
    %80 = vector.load %arg12[%c0_52, %c384_53] : memref<8x640xf32, #tpu.memory_space<vmem>>, vector<8x128xf32>
    tpu.vector_store %arg12[%c0_52, %c384_53], %79 {strides = array<i32>} : memref<8x640xf32, #tpu.memory_space<vmem>>, vector<8x128xf32>,
    %c0_54 = arith.constant 0 : index
    %c512 = arith.constant 512 : index
    %81 = vector.load %arg7[%c0_54, %c512] : memref<16x640xbf16, #tpu.memory_space<vmem>>, vector<16x128xbf16>
    %cst_55 = arith.constant dense<0.000000e+00> : vector<64x128xf32>
    %82 = tpu.matmul %16, %81, %cst_55 {dimension_numbers = #tpu.dot_dimension_numbers<[1], [0], [0], [1], [0, 0, 1, 1], [], []>} : vector<64x16xbf16>, vector<16x128xbf16>, vector<64x128xf32> -> vector<64x128xf32>
    %cst_56 = arith.constant 3.000000e+00 : f32
    %83 = vector.broadcast %cst_56 : f32 to vector<64x128xf32>
    %84 = arith.addf %82, %83 : vector<64x128xf32>
    %cst_57 = arith.constant 0.000000e+00 : f32
    %cst_58 = arith.constant 6.000000e+00 : f32
    %85 = vector.broadcast %cst_57 : f32 to vector<64x128xf32>
    %86 = arith.maximumf %85, %84 : vector<64x128xf32>
    %87 = vector.broadcast %cst_58 : f32 to vector<64x128xf32>
    %88 = arith.minimumf %87, %86 : vector<64x128xf32>
    %89 = arith.mulf %82, %88 : vector<64x128xf32>
    %cst_59 = arith.constant 0.166666672 : f32
    %90 = vector.broadcast %cst_59 : f32 to vector<64x128xf32>
    %91 = arith.mulf %89, %90 : vector<64x128xf32>
    %c0_60 = arith.constant 0 : index
    %c512_61 = arith.constant 512 : index
    %92 = vector.load %arg12[%c0_60, %c512_61] : memref<8x640xf32, #tpu.memory_space<vmem>>, vector<8x128xf32>
    %93 = vector.shape_cast %91 : vector<64x128xf32> to vector<8x8x128xf32>
    %cst_62 = arith.constant dense<0.000000e+00> : vector<8x128xf32>
    %94 = vector.multi_reduction <add>, %93, %cst_62 [0] : vector<8x8x128xf32> to vector<8x128xf32>
    %95 = arith.addf %92, %94 : vector<8x128xf32>
    %c0_63 = arith.constant 0 : index
    %c512_64 = arith.constant 512 : index
    %96 = vector.load %arg12[%c0_63, %c512_64] : memref<8x640xf32, #tpu.memory_space<vmem>>, vector<8x128xf32>
    tpu.vector_store %arg12[%c0_63, %c512_64], %95 {strides = array<i32>} : memref<8x640xf32, #tpu.memory_space<vmem>>, vector<8x128xf32>,
    %c0_65 = arith.constant 0 : index
    %c0_66 = arith.constant 0 : index
    %c0_67 = arith.constant 0 : index
    %97 = vector.load %arg4[%c0_65, %c0_66, %c0_67] : memref<1x64x9xbf16, #tpu.memory_space<vmem>>, vector<1x64x9xbf16>
    %98 = vector.shape_cast %97 : vector<1x64x9xbf16> to vector<64x9xbf16>
    %c0_68 = arith.constant 0 : index
    %c0_69 = arith.constant 0 : index
    %99 = vector.load %arg6[%c0_68, %c0_69] : memref<9x16xbf16, #tpu.memory_space<vmem>>, vector<9x16xbf16>
    %cst_70 = arith.constant dense<0.000000e+00> : vector<64x16xf32>
    %100 = tpu.matmul %98, %99, %cst_70 {dimension_numbers = #tpu.dot_dimension_numbers<[1], [0], [0], [1], [0, 0, 1, 1], [], []>} : vector<64x9xbf16>, vector<9x16xbf16>, vector<64x16xf32> -> vector<64x16xf32>
    %cst_71 = arith.constant 3.000000e+00 : f32
    %101 = vector.broadcast %cst_71 : f32 to vector<64x16xf32>
    %102 = arith.addf %100, %101 : vector<64x16xf32>
    %cst_72 = arith.constant 0.000000e+00 : f32
    %cst_73 = arith.constant 6.000000e+00 : f32
    %103 = vector.broadcast %cst_72 : f32 to vector<64x16xf32>
    %104 = arith.maximumf %103, %102 : vector<64x16xf32>
    %105 = vector.broadcast %cst_73 : f32 to vector<64x16xf32>
    %106 = arith.minimumf %105, %104 : vector<64x16xf32>
    %107 = arith.mulf %100, %106 : vector<64x16xf32>
    %cst_74 = arith.constant 0.166666672 : f32
    %108 = vector.broadcast %cst_74 : f32 to vector<64x16xf32>
    %109 = arith.mulf %107, %108 : vector<64x16xf32>
    %110 = arith.truncf %109 : vector<64x16xf32> to vector<64x16xbf16>
    %c0_75 = arith.constant 0 : index
    %c0_76 = arith.constant 0 : index
    %111 = vector.load %arg7[%c0_75, %c0_76] : memref<16x640xbf16, #tpu.memory_space<vmem>>, vector<16x128xbf16>
    %cst_77 = arith.constant dense<0.000000e+00> : vector<64x128xf32>
    %112 = tpu.matmul %110, %111, %cst_77 {dimension_numbers = #tpu.dot_dimension_numbers<[1], [0], [0], [1], [0, 0, 1, 1], [], []>} : vector<64x16xbf16>, vector<16x128xbf16>, vector<64x128xf32> -> vector<64x128xf32>
    %cst_78 = arith.constant 3.000000e+00 : f32
    %113 = vector.broadcast %cst_78 : f32 to vector<64x128xf32>
    %114 = arith.addf %112, %113 : vector<64x128xf32>
    %cst_79 = arith.constant 0.000000e+00 : f32
    %cst_80 = arith.constant 6.000000e+00 : f32
    %115 = vector.broadcast %cst_79 : f32 to vector<64x128xf32>
    %116 = arith.maximumf %115, %114 : vector<64x128xf32>
    %117 = vector.broadcast %cst_80 : f32 to vector<64x128xf32>
    %118 = arith.minimumf %117, %116 : vector<64x128xf32>
    %119 = arith.mulf %112, %118 : vector<64x128xf32>
    %cst_81 = arith.constant 0.166666672 : f32
    %120 = vector.broadcast %cst_81 : f32 to vector<64x128xf32>
    %121 = arith.mulf %119, %120 : vector<64x128xf32>
    %c0_82 = arith.constant 0 : index
    %c0_83 = arith.constant 0 : index
    %122 = vector.load %arg13[%c0_82, %c0_83] : memref<8x640xf32, #tpu.memory_space<vmem>>, vector<8x128xf32>
    %123 = vector.shape_cast %121 : vector<64x128xf32> to vector<8x8x128xf32>
    %cst_84 = arith.constant dense<0.000000e+00> : vector<8x128xf32>
    %124 = vector.multi_reduction <add>, %123, %cst_84 [0] : vector<8x8x128xf32> to vector<8x128xf32>
    %125 = arith.addf %122, %124 : vector<8x128xf32>
    %c0_85 = arith.constant 0 : index
    %c0_86 = arith.constant 0 : index
    %126 = vector.load %arg13[%c0_85, %c0_86] : memref<8x640xf32, #tpu.memory_space<vmem>>, vector<8x128xf32>
    tpu.vector_store %arg13[%c0_85, %c0_86], %125 {strides = array<i32>} : memref<8x640xf32, #tpu.memory_space<vmem>>, vector<8x128xf32>,
    %c0_87 = arith.constant 0 : index
    %c128_88 = arith.constant 128 : index
    %127 = vector.load %arg7[%c0_87, %c128_88] : memref<16x640xbf16, #tpu.memory_space<vmem>>, vector<16x128xbf16>
    %cst_89 = arith.constant dense<0.000000e+00> : vector<64x128xf32>
    %128 = tpu.matmul %110, %127, %cst_89 {dimension_numbers = #tpu.dot_dimension_numbers<[1], [0], [0], [1], [0, 0, 1, 1], [], []>} : vector<64x16xbf16>, vector<16x128xbf16>, vector<64x128xf32> -> vector<64x128xf32>
    %cst_90 = arith.constant 3.000000e+00 : f32
    %129 = vector.broadcast %cst_90 : f32 to vector<64x128xf32>
    %130 = arith.addf %128, %129 : vector<64x128xf32>
    %cst_91 = arith.constant 0.000000e+00 : f32
    %cst_92 = arith.constant 6.000000e+00 : f32
    %131 = vector.broadcast %cst_91 : f32 to vector<64x128xf32>
    %132 = arith.maximumf %131, %130 : vector<64x128xf32>
    %133 = vector.broadcast %cst_92 : f32 to vector<64x128xf32>
    %134 = arith.minimumf %133, %132 : vector<64x128xf32>
    %135 = arith.mulf %128, %134 : vector<64x128xf32>
    %cst_93 = arith.constant 0.166666672 : f32
    %136 = vector.broadcast %cst_93 : f32 to vector<64x128xf32>
    %137 = arith.mulf %135, %136 : vector<64x128xf32>
    %c0_94 = arith.constant 0 : index
    %c128_95 = arith.constant 128 : index
    %138 = vector.load %arg13[%c0_94, %c128_95] : memref<8x640xf32, #tpu.memory_space<vmem>>, vector<8x128xf32>
    %139 = vector.shape_cast %137 : vector<64x128xf32> to vector<8x8x128xf32>
    %cst_96 = arith.constant dense<0.000000e+00> : vector<8x128xf32>
    %140 = vector.multi_reduction <add>, %139, %cst_96 [0] : vector<8x8x128xf32> to vector<8x128xf32>
    %141 = arith.addf %138, %140 : vector<8x128xf32>
    %c0_97 = arith.constant 0 : index
    %c128_98 = arith.constant 128 : index
    %142 = vector.load %arg13[%c0_97, %c128_98] : memref<8x640xf32, #tpu.memory_space<vmem>>, vector<8x128xf32>
    tpu.vector_store %arg13[%c0_97, %c128_98], %141 {strides = array<i32>} : memref<8x640xf32, #tpu.memory_space<vmem>>, vector<8x128xf32>,
    %c0_99 = arith.constant 0 : index
    %c256_100 = arith.constant 256 : index
    %143 = vector.load %arg7[%c0_99, %c256_100] : memref<16x640xbf16, #tpu.memory_space<vmem>>, vector<16x128xbf16>
    %cst_101 = arith.constant dense<0.000000e+00> : vector<64x128xf32>
    %144 = tpu.matmul %110, %143, %cst_101 {dimension_numbers = #tpu.dot_dimension_numbers<[1], [0], [0], [1], [0, 0, 1, 1], [], []>} : vector<64x16xbf16>, vector<16x128xbf16>, vector<64x128xf32> -> vector<64x128xf32>
    %cst_102 = arith.constant 3.000000e+00 : f32
    %145 = vector.broadcast %cst_102 : f32 to vector<64x128xf32>
    %146 = arith.addf %144, %145 : vector<64x128xf32>
    %cst_103 = arith.constant 0.000000e+00 : f32
    %cst_104 = arith.constant 6.000000e+00 : f32
    %147 = vector.broadcast %cst_103 : f32 to vector<64x128xf32>
    %148 = arith.maximumf %147, %146 : vector<64x128xf32>
    %149 = vector.broadcast %cst_104 : f32 to vector<64x128xf32>
    %150 = arith.minimumf %149, %148 : vector<64x128xf32>
    %151 = arith.mulf %144, %150 : vector<64x128xf32>
    %cst_105 = arith.constant 0.166666672 : f32
    %152 = vector.broadcast %cst_105 : f32 to vector<64x128xf32>
    %153 = arith.mulf %151, %152 : vector<64x128xf32>
    %c0_106 = arith.constant 0 : index
    %c256_107 = arith.constant 256 : index
    %154 = vector.load %arg13[%c0_106, %c256_107] : memref<8x640xf32, #tpu.memory_space<vmem>>, vector<8x128xf32>
    %155 = vector.shape_cast %153 : vector<64x128xf32> to vector<8x8x128xf32>
    %cst_108 = arith.constant dense<0.000000e+00> : vector<8x128xf32>
    %156 = vector.multi_reduction <add>, %155, %cst_108 [0] : vector<8x8x128xf32> to vector<8x128xf32>
    %157 = arith.addf %154, %156 : vector<8x128xf32>
    %c0_109 = arith.constant 0 : index
    %c256_110 = arith.constant 256 : index
    %158 = vector.load %arg13[%c0_109, %c256_110] : memref<8x640xf32, #tpu.memory_space<vmem>>, vector<8x128xf32>
    tpu.vector_store %arg13[%c0_109, %c256_110], %157 {strides = array<i32>} : memref<8x640xf32, #tpu.memory_space<vmem>>, vector<8x128xf32>,
    %c0_111 = arith.constant 0 : index
    %c384_112 = arith.constant 384 : index
    %159 = vector.load %arg7[%c0_111, %c384_112] : memref<16x640xbf16, #tpu.memory_space<vmem>>, vector<16x128xbf16>
    %cst_113 = arith.constant dense<0.000000e+00> : vector<64x128xf32>
    %160 = tpu.matmul %110, %159, %cst_113 {dimension_numbers = #tpu.dot_dimension_numbers<[1], [0], [0], [1], [0, 0, 1, 1], [], []>} : vector<64x16xbf16>, vector<16x128xbf16>, vector<64x128xf32> -> vector<64x128xf32>
    %cst_114 = arith.constant 3.000000e+00 : f32
    %161 = vector.broadcast %cst_114 : f32 to vector<64x128xf32>
    %162 = arith.addf %160, %161 : vector<64x128xf32>
    %cst_115 = arith.constant 0.000000e+00 : f32
    %cst_116 = arith.constant 6.000000e+00 : f32
    %163 = vector.broadcast %cst_115 : f32 to vector<64x128xf32>
    %164 = arith.maximumf %163, %162 : vector<64x128xf32>
    %165 = vector.broadcast %cst_116 : f32 to vector<64x128xf32>
    %166 = arith.minimumf %165, %164 : vector<64x128xf32>
    %167 = arith.mulf %160, %166 : vector<64x128xf32>
    %cst_117 = arith.constant 0.166666672 : f32
    %168 = vector.broadcast %cst_117 : f32 to vector<64x128xf32>
    %169 = arith.mulf %167, %168 : vector<64x128xf32>
    %c0_118 = arith.constant 0 : index
    %c384_119 = arith.constant 384 : index
    %170 = vector.load %arg13[%c0_118, %c384_119] : memref<8x640xf32, #tpu.memory_space<vmem>>, vector<8x128xf32>
    %171 = vector.shape_cast %169 : vector<64x128xf32> to vector<8x8x128xf32>
    %cst_120 = arith.constant dense<0.000000e+00> : vector<8x128xf32>
    %172 = vector.multi_reduction <add>, %171, %cst_120 [0] : vector<8x8x128xf32> to vector<8x128xf32>
    %173 = arith.addf %170, %172 : vector<8x128xf32>
    %c0_121 = arith.constant 0 : index
    %c384_122 = arith.constant 384 : index
    %174 = vector.load %arg13[%c0_121, %c384_122] : memref<8x640xf32, #tpu.memory_space<vmem>>, vector<8x128xf32>
    tpu.vector_store %arg13[%c0_121, %c384_122], %173 {strides = array<i32>} : memref<8x640xf32, #tpu.memory_space<vmem>>, vector<8x128xf32>,
    %c0_123 = arith.constant 0 : index
    %c512_124 = arith.constant 512 : index
    %175 = vector.load %arg7[%c0_123, %c512_124] : memref<16x640xbf16, #tpu.memory_space<vmem>>, vector<16x128xbf16>
    %cst_125 = arith.constant dense<0.000000e+00> : vector<64x128xf32>
    %176 = tpu.matmul %110, %175, %cst_125 {dimension_numbers = #tpu.dot_dimension_numbers<[1], [0], [0], [1], [0, 0, 1, 1], [], []>} : vector<64x16xbf16>, vector<16x128xbf16>, vector<64x128xf32> -> vector<64x128xf32>
    %cst_126 = arith.constant 3.000000e+00 : f32
    %177 = vector.broadcast %cst_126 : f32 to vector<64x128xf32>
    %178 = arith.addf %176, %177 : vector<64x128xf32>
    %cst_127 = arith.constant 0.000000e+00 : f32
    %cst_128 = arith.constant 6.000000e+00 : f32
    %179 = vector.broadcast %cst_127 : f32 to vector<64x128xf32>
    %180 = arith.maximumf %179, %178 : vector<64x128xf32>
    %181 = vector.broadcast %cst_128 : f32 to vector<64x128xf32>
    %182 = arith.minimumf %181, %180 : vector<64x128xf32>
    %183 = arith.mulf %176, %182 : vector<64x128xf32>
    %cst_129 = arith.constant 0.166666672 : f32
    %184 = vector.broadcast %cst_129 : f32 to vector<64x128xf32>
    %185 = arith.mulf %183, %184 : vector<64x128xf32>
    %c0_130 = arith.constant 0 : index
    %c512_131 = arith.constant 512 : index
    %186 = vector.load %arg13[%c0_130, %c512_131] : memref<8x640xf32, #tpu.memory_space<vmem>>, vector<8x128xf32>
    %187 = vector.shape_cast %185 : vector<64x128xf32> to vector<8x8x128xf32>
    %cst_132 = arith.constant dense<0.000000e+00> : vector<8x128xf32>
    %188 = vector.multi_reduction <add>, %187, %cst_132 [0] : vector<8x8x128xf32> to vector<8x128xf32>
    %189 = arith.addf %186, %188 : vector<8x128xf32>
    %c0_133 = arith.constant 0 : index
    %c512_134 = arith.constant 512 : index
    %190 = vector.load %arg13[%c0_133, %c512_134] : memref<8x640xf32, #tpu.memory_space<vmem>>, vector<8x128xf32>
    tpu.vector_store %arg13[%c0_133, %c512_134], %189 {strides = array<i32>} : memref<8x640xf32, #tpu.memory_space<vmem>>, vector<8x128xf32>,
    %c0_i32_135 = arith.constant 0 : i32
    %191 = arith.cmpi eq, %arg2, %c0_i32_135 : i32
    %192 = arith.extui %191 : i1 to i32
    %c0_i32_136 = arith.constant 0 : i32
    %193 = arith.cmpi ne, %192, %c0_i32_136 : i32
    scf.if %193 {
      %c0_137 = arith.constant 0 : index
      %c0_138 = arith.constant 0 : index
      %194 = vector.load %arg12[%c0_137, %c0_138] : memref<8x640xf32, #tpu.memory_space<vmem>>, vector<8x640xf32>
      %cst_139 = arith.constant dense<0.000000e+00> : vector<640xf32>
      %195 = vector.multi_reduction <add>, %194, %cst_139 [0] : vector<8x640xf32> to vector<640xf32>
      %196 = vector.shape_cast %195 : vector<640xf32> to vector<1x640xf32>
      %cst_140 = arith.constant 1.562500e-02 : f32
      %197 = vector.broadcast %cst_140 : f32 to vector<1x640xf32>
      %198 = arith.mulf %196, %197 : vector<1x640xf32>
      %c0_141 = arith.constant 0 : index
      %c0_142 = arith.constant 0 : index
      %199 = vector.load %arg13[%c0_141, %c0_142] : memref<8x640xf32, #tpu.memory_space<vmem>>, vector<8x640xf32>
      %cst_143 = arith.constant dense<0.000000e+00> : vector<640xf32>
      %200 = vector.multi_reduction <add>, %199, %cst_143 [0] : vector<8x640xf32> to vector<640xf32>
      %201 = vector.shape_cast %200 : vector<640xf32> to vector<1x640xf32>
      %cst_144 = arith.constant 1.562500e-02 : f32
      %202 = vector.broadcast %cst_144 : f32 to vector<1x640xf32>
      %203 = arith.mulf %201, %202 : vector<1x640xf32>
      %204 = arith.truncf %198 : vector<1x640xf32> to vector<1x640xbf16>
      %c0_145 = arith.constant 0 : index
      %c0_146 = arith.constant 0 : index
      %205 = vector.load %arg8[%c0_145, %c0_146] : memref<640x128xbf16, #tpu.memory_space<vmem>>, vector<640x128xbf16>
      %cst_147 = arith.constant dense<0.000000e+00> : vector<1x128xf32>
      %206 = tpu.matmul %204, %205, %cst_147 {dimension_numbers = #tpu.dot_dimension_numbers<[1], [0], [0], [1], [0, 0, 1, 1], [], []>} : vector<1x640xbf16>, vector<640x128xbf16>, vector<1x128xf32> -> vector<1x128xf32>
      %207 = arith.truncf %203 : vector<1x640xf32> to vector<1x640xbf16>
      %c0_148 = arith.constant 0 : index
      %c0_149 = arith.constant 0 : index
      %208 = vector.load %arg9[%c0_148, %c0_149] : memref<640x128xbf16, #tpu.memory_space<vmem>>, vector<640x128xbf16>
      %cst_150 = arith.constant dense<0.000000e+00> : vector<1x128xf32>
      %209 = tpu.matmul %207, %208, %cst_150 {dimension_numbers = #tpu.dot_dimension_numbers<[1], [0], [0], [1], [0, 0, 1, 1], [], []>} : vector<1x640xbf16>, vector<640x128xbf16>, vector<1x128xf32> -> vector<1x128xf32>
      %210 = vector.shape_cast %206 : vector<1x128xf32> to vector<1x1x1x128xf32>
      %c0_151 = arith.constant 0 : index
      %c0_152 = arith.constant 0 : index
      %c0_153 = arith.constant 0 : index
      %c0_154 = arith.constant 0 : index
      %211 = vector.load %arg10[%c0_151, %c0_152, %c0_153, %c0_154] : memref<1x1x1x128xf32, #tpu.memory_space<vmem>>, vector<1x1x1x128xf32>
      tpu.vector_store %arg10[%c0_151, %c0_152, %c0_153, %c0_154], %210 {strides = array<i32>} : memref<1x1x1x128xf32, #tpu.memory_space<vmem>>, vector<1x1x1x128xf32>,
      %212 = vector.shape_cast %209 : vector<1x128xf32> to vector<1x1x1x128xf32>
      %c0_155 = arith.constant 0 : index
      %c0_156 = arith.constant 0 : index
      %c0_157 = arith.constant 0 : index
      %c0_158 = arith.constant 0 : index
      %213 = vector.load %arg11[%c0_155, %c0_156, %c0_157, %c0_158] : memref<1x1x1x128xf32, #tpu.memory_space<vmem>>, vector<1x1x1x128xf32>
      tpu.vector_store %arg11[%c0_155, %c0_156, %c0_157, %c0_158], %212 {strides = array<i32>} : memref<1x1x1x128xf32, #tpu.memory_space<vmem>>, vector<1x1x1x128xf32>,
    } else {
    }
    return
  }
  func.func @transform_0(%arg0: i32, %arg1: i32, %arg2: i32) -> (i32, i32, i32) {
    %c0_i32 = arith.constant 0 : i32
    %c0_i32_0 = arith.constant 0 : i32
    return %arg0, %arg2, %c0_i32 : i32, i32, i32
  }
  func.func @transform_1(%arg0: i32, %arg1: i32, %arg2: i32) -> (i32, i32, i32) {
    %c0_i32 = arith.constant 0 : i32
    %c0_i32_0 = arith.constant 0 : i32
    return %arg0, %arg2, %c0_i32 : i32, i32, i32
  }
  func.func @transform_2(%arg0: i32, %arg1: i32, %arg2: i32) -> (i32, i32) {
    %c0_i32 = arith.constant 0 : i32
    %c0_i32_0 = arith.constant 0 : i32
    %c0_i32_1 = arith.constant 0 : i32
    return %c0_i32, %c0_i32_0 : i32, i32
  }
  func.func @transform_3(%arg0: i32, %arg1: i32, %arg2: i32) -> (i32, i32) {
    %c0_i32 = arith.constant 0 : i32
    %c0_i32_0 = arith.constant 0 : i32
    %c0_i32_1 = arith.constant 0 : i32
    return %c0_i32, %c0_i32_0 : i32, i32
  }
  func.func @transform_4(%arg0: i32, %arg1: i32, %arg2: i32) -> (i32, i32) {
    %c0_i32 = arith.constant 0 : i32
    %c0_i32_0 = arith.constant 0 : i32
    return %c0_i32, %arg1 : i32, i32
  }
  func.func @transform_5(%arg0: i32, %arg1: i32, %arg2: i32) -> (i32, i32) {
    %c0_i32 = arith.constant 0 : i32
    %c0_i32_0 = arith.constant 0 : i32
    return %arg1, %c0_i32 : i32, i32
  }
  func.func @transform_6(%arg0: i32, %arg1: i32, %arg2: i32) -> (i32, i32) {
    %c0_i32 = arith.constant 0 : i32
    %c0_i32_0 = arith.constant 0 : i32
    return %arg1, %c0_i32 : i32, i32
  }
  func.func @transform_7(%arg0: i32, %arg1: i32, %arg2: i32) -> (i32, i32, i32, i32) {
    %c0_i32 = arith.constant 0 : i32
    %c0_i32_0 = arith.constant 0 : i32
    %c0_i32_1 = arith.constant 0 : i32
    return %arg0, %arg1, %c0_i32, %c0_i32_0 : i32, i32, i32, i32
  }
  func.func @transform_8(%arg0: i32, %arg1: i32, %arg2: i32) -> (i32, i32, i32, i32) {
    %c0_i32 = arith.constant 0 : i32
    %c0_i32_0 = arith.constant 0 : i32
    %c0_i32_1 = arith.constant 0 : i32
    return %arg0, %arg1, %c0_i32, %c0_i32_0 : i32, i32, i32, i32
  }
}

</mosaic_0001>

<bundles_post_ra>
// kernel: two_stream_fall_net.3
= control target key start
LH: loop header
LB: loop body
LE: loop exit
PB: predicated region body
PF: predicated region fallthrough
CT: control target
= control target key end

     0   :  { %vm20_vm0 = vcmask 1041408   ;;  %s270_s0 = inlined_call_operand.vmem [shape: f32[2,2,128], index: 0, kind: input, shape index: {}]   ;;  %s271_s1 = inlined_call_operand.vmem [shape: f32[2,2,128], index: 1, kind: input, shape index: {}]   ;;  %s272_s2 = inlined_call_operand.vmem [shape: f32[1,128], index: 2, kind: input, shape index: {}]   ;;  %s273_s3 = inlined_call_operand.vmem [shape: f32[1,128], index: 3, kind: input, shape index: {}]   ;;  %s274_s4 = inlined_call_operand.hbm [shape: f32[2,128], index: 4, kind: output, shape index: {}]  }
   0x1   :  { %v44_v0 = vld [vmem:[%s271_s1] sm:$0x3]  ;;  %v45_v1 = vld [vmem:[%s271_s1 + $0x2] sm:$0x3] }
   0x2   :  { %v46_v2 = vsel %vm20_vm0, %v44_v0, 0.0  ;;  %v53_v3 = vsel %vm20_vm0, %v45_v1, 0.0  ;;  %v18_v4 = vld [vmem:[%s270_s0] sm:$0x3]  ;;  %v19_v7 = vld [vmem:[%s270_s0 + $0x2] sm:$0x3] }
   0x3   :  { %v47_v5 = vrot.slane %v46_v2, 4  ;;  %v54_v6 = vrot.slane %v53_v3, 4  ;;  %v21_v8 = vsel %vm20_vm0, %v18_v4, 0.0  ;;  %v28_v10 = vsel %vm20_vm0, %v19_v7, 0.0 }
   0x4   :  { %v22_v9 = vrot.slane %v21_v8, 4 }
   0x5   :  { %9 = vsyncpa [#allocation3], 0  ;;  %v48_v11 = vadd.f32 %v47_v5, %v46_v2  ;;  %v55_v12 = vadd.f32 %v54_v6, %v53_v3  ;;  %v29_v13 = vrot.slane %v28_v10, 4  ;;  %v163_v26 = vld [vmem:[%s273_s3] ss:$0 sm:$0xff]  ;;  %vm72_vm1 = vcmask 1041409  }
   0x6   :  { %v23_v14 = vadd.f32 %v22_v9, %v21_v8  ;;  %v162_v32 = vld [vmem:[%s272_s2] ss:$0 sm:$0xff]  ;;  %s201_s2 = smov [#allocation2]  }
   0x7   :  { %v49_v15 = vrot.slane %v48_v11, 2  ;;  %v56_v16 = vrot.slane %v55_v12, 2  ;;  %v30_v17 = vadd.f32 %v29_v13, %v28_v10  ;;  %s154_s3 = sshll.u32 %s201_s2, 4  ;;  %s155_s3 = int_to_ptr.vmem [resolvable:$true] %s154_s3 }
   0x8   :  { %v24_v18 = vrot.slane %v23_v14, 2  ;;  %s177_s25 = scalar_lea.vmem %s155_s3, 32  ;;  %p182_p1 = scmp.lt.s32.totalorder %s155_s3, %s155_s3 }
   0x9   :  { %v50_v19 = vadd.f32 %v49_v15, %v48_v11  ;;  %v57_v20 = vadd.f32 %v56_v16, %v55_v12  ;;  %v31_v21 = vrot.slane %v30_v17, 2  ;;  %p178_p0 = scmp.ne.s32.totalorder %s155_s3, %s177_s25  ;;  %p183_p2 = scmp.lt.s32.totalorder %s177_s25, %s177_s25 }
   0xa   :  { %v25_v22 = vadd.f32 %v24_v18, %v23_v14 }
   0xb   :  { %v51_v23 = vrot.slane %v50_v19, 1  ;;  %v58_v24 = vrot.slane %v57_v20, 1  ;;  %v32_v25 = vadd.f32 %v31_v21, %v30_v17  ;;  %p184_p3 = por %p183_p2, %p182_p1 }
   0xc   :  { %v26_v27 = vrot.slane %v25_v22, 1 }
   0xd   :  { %v52_v28 = vadd.f32 %v51_v23, %v50_v19  ;;  %v59_v29 = vadd.f32 %v58_v24, %v57_v20  ;;  %v33_v30 = vrot.slane %v32_v25, 1  ;;  %p185_p4 = pnand %p184_p3, %p178_p0 }
   0xe   :  { %v27_v31 = vadd.f32 %v26_v27, %v25_v22 }
   0xf   :  { %v67_v33 = vadd.f32 %v163_v26, %v52_v28  ;;  %v68_v34 = vadd.f32 %v163_v26, %v59_v29  ;;  %v34_v35 = vadd.f32 %v33_v30, %v32_v25 }
  0x10   :  { %v42_v37 = vadd.f32 %v162_v32, %v27_v31 }
  0x11   :  { %v105_v36 = vrot.slane %v68_v34, 7  ;;  %v43_v38 = vadd.f32 %v162_v32, %v34_v35 }
  0x13   :  { %v106_v39 = vsel %vm72_vm1, %v105_v36, %v67_v33  ;;  %v71_v40 = vrot.slane %v43_v38, 7 }
  0x14   :  { %v108_v41 = vsel %vm20_vm0, %v106_v39, -inf }
  0x15   :  { %109 = vmax.xlane.f32.xlu0 %v108_v41  ;;  %v73_v42 = vsel %vm72_vm1, %v71_v40, %v42_v37 }
  0x16   :  { %v75_v43 = vsel %vm20_vm0, %v73_v42, -inf }
  0x19   :  { %76 = vmax.xlane.f32.xlu0 %v75_v43 }
  0xa2   :  { %v110_v44 = vpop.xlane.xlu0 %109 }
  0xa3   :  { %v112_v45 = vrot.slane %v110_v44, 1  ;;  %v115_v46 = vsub.f32 %v67_v33, %v110_v44 }
  0xa5   :  { %v116_v47 = vsub.f32 %v68_v34, %v112_v45  ;;  %v117_v49 = vmul.f32 1.442695, %v115_v46 }
  0xa6   :  { %v77_v48 = vpop.xlane.xlu0 %76 }
  0xa7   :  { %v119_v50 = vmul.f32 1.442695, %v116_v47  ;;  %v79_v51 = vrot.slane %v77_v48, 1  ;;  %v82_v52 = vsub.f32 %v42_v37, %v77_v48 }
  0xa9   :  { %165 = vpow2.f32 %v119_v50  ;;  %v83_v53 = vsub.f32 %v43_v38, %v79_v51  ;;  %v84_v54 = vmul.f32 1.442695, %v82_v52 }
  0xaa   :  { %167 = vpow2.f32 %v117_v49 }
  0xab   :  { %v86_v55 = vmul.f32 1.442695, %v83_v53 }
  0xad   :  { %169 = vpow2.f32 %v86_v55 }
  0xae   :  { %171 = vpow2.f32 %v84_v54 }
  0xb3   :  { %v166_v56 = vpop.eup %165 }
  0xb4   :  { %v123_v57 = vrot.slane %v166_v56, 7  ;;  %v168_v58 = vpop.eup %167 }
  0xb6   :  { %v124_v59 = vsel %vm72_vm1, %v123_v57, %v168_v58 }
  0xb7   :  { %v170_v60 = vpop.eup %169  ;;  %v126_v61 = vsel %vm20_vm0, %v124_v59, 0.0 }
  0xb8   :  { %127 = vadd.xlane.f32.xlu1 %v126_v61  ;;  %v90_v62 = vrot.slane %v170_v60, 7  ;;  %v172_v63 = vpop.eup %171 }
  0xba   :  { %v91_v0 = vsel %vm72_vm1, %v90_v62, %v172_v63 }
  0xbb   :  { %v93_v1 = vsel %vm20_vm0, %v91_v0, 0.0 }
  0xbc   :  { %94 = vadd.xlane.f32.xlu1 %v93_v1 }
 0x145   :  { %v128_v2 = vpop.xlane.xlu1 %127 }
 0x146   :  { %173 = vrcp.f32 %v128_v2 }
 0x149   :  { %v95_v3 = vpop.xlane.xlu1 %94 }
 0x14a   :  { %175 = vrcp.f32 %v95_v3 }
 0x150   :  { %v174_v4 = vpop.eup %173 }
 0x151   :  { %v131_v5 = vrot.slane %v174_v4, 1  ;;  %v134_v6 = vmul.f32 %v174_v4, %v168_v58 }
 0x153   :  { %v135_v7 = vmul.f32 %v166_v56, %v131_v5  ;;  %v136_v12 = vmul.f32 2.0, %v134_v6 }
 0x154   :  { %v176_v8 = vpop.eup %175 }
 0x155   :  { %v98_v9 = vrot.slane %v176_v8, 1  ;;  %v101_v10 = vmul.f32 %v176_v8, %v172_v63  ;;  %v137_v13 = vmul.f32 2.0, %v135_v7 }
 0x157   :  { %v102_v11 = vmul.f32 %v170_v60, %v98_v9  ;;  %v138_v14 = vadd.f32 %v136_v12, %v101_v10 }
 0x159   :  { %v139_v15 = vadd.f32 %v137_v13, %v102_v11  ;;  %v140_v17 = vmul.f32 0.33333334, %v138_v14 }
 0x15b   :  { %v141_v16 = vmul.f32 0.33333334, %v139_v15 }
 0x15d   :  { %v144_v18 = vrot.slane %v141_v16, 7 }
 0x15f   :  { %v145_v19 = vsel %vm72_vm1, %v144_v18, %v140_v17 }
 0x160   :  { %147 = vst [vmem:[#allocation2] sm:$0x3] %v145_v19 }
 0x161   :  { %188 = shalt.err (!%p185_p4)
}
 0x162   :  { %s189_s28 = scalar_lea.hbm %s274_s4, 32 }
 0x163   :  { %p190_p5 = scmp.ne.s32.totalorder %s274_s4, %s189_s28  ;;  %p193_p6 = scmp.lt.u32.totalorder %s189_s28, %s274_s4 }
 0x165   :  { %p195_p7 = pnand %p193_p6, %p190_p5 }
 0x167   :  { %198 = shalt.err (!%p195_p7)
}
 0x168   :  { %157 = dma.vmem_to_hbm [thread:$0]  %s155_s3, 32, %s274_s4, [#allocation3]  }
 0x169   :  { %199 = dma.done.wait [#allocation3], 32  }
 0x16a   :  { %200 = vsyncadd [#allocation3], 4294967264 }
 0x16b   :  { %161 = vsyncpa [#allocation3], 1 }

// kernel: two_stream_fall_net.2
= control target key start
LH: loop header
LB: loop body
LE: loop exit
PB: predicated region body
PF: predicated region fallthrough
CT: control target
= control target key end

     0   :  { %s4041_s27 = smov 0   ;;  %s4043_s28 = smov 0   ;;  %s4573_s0 = inlined_call_operand.vmem [shape: bf16[2,64,27], index: 0, kind: input, shape index: {}]   ;;  %s4574_s1 = inlined_call_operand.vmem [shape: bf16[2,64,9], index: 1, kind: input, shape index: {}]   ;;  %s4575_s2 = inlined_call_operand.vmem [shape: bf16[27,16], index: 2, kind: input, shape index: {}]   ;;  %s4576_s3 = inlined_call_operand.vmem [shape: bf16[9,16], index: 3, kind: input, shape index: {}]   ;;  %s4577_s4 = inlined_call_operand.vmem [shape: bf16[16,1280], index: 4, kind: input, shape index: {}]   ;;  %s4578_s5 = inlined_call_operand.vmem [shape: bf16[1280,128], index: 5, kind: input, shape index: {}]   ;;  %s4579_s6 = inlined_call_operand.vmem [shape: bf16[1280,128], index: 6, kind: input, shape index: {}]   ;;  %s4580_s7 = inlined_call_operand.vmem [shape: f32[2,2,1,128], index: 7, kind: output, shape index: {0}]   ;;  %s4581_s8 = inlined_call_operand.vmem [shape: f32[2,2,1,128], index: 8, kind: output, shape index: {1}]  }
   0x1   :  { %s4045_s29 = smov 0   ;;  %s4047_s30 = smov 0  }
   0x2   :  { %s4049_s9 = smov 0   ;;  %s4051_s10 = smov 0  }
   0x3   :  { %s4053_s11 = smov 0  }
   0x4 LB: > { %s34_s12 = sadd.s32 1, %s3983_s9  ;;  %s38_s13 = sadd.s32 1, %s3987_s10  ;;  %s3991_s11 = sphi %s4053_s11, %s19_s11   ;;  %s3987_s10 = sphi %s4051_s10, %s4587_s10   ;;  %s3983_s9 = sphi %s4049_s9, %s4586_s9   ;;  %s3979_s30 = sphi %s4047_s30, %s4585_s30   ;;  %s3975_s29 = sphi %s4045_s29, %s4584_s29   ;;  %s3971_s28 = sphi %s4043_s28, %s4583_s28   ;;  %s3967_s27 = sphi %s4041_s27, %s4582_s27  }
   0x5   : > { %p36_p0 = scmp.ge.s32.totalorder %s34_s12, 2  ;;  %s143_s14 = sadd.s32 1, %s3971_s28 }
   0x6   : > { %p150_p1 = scmp.ne.s32.totalorder %s3971_s28, %s3967_s27  ;;  %p151_p2 = scmp.eq.s32.totalorder %s3991_s11, 0 }
   0x7   : > { %s4589_s12 = smov (%p36_p0, %s34_s12), 0  ;;  %s4591_s13 = smov (!%p36_p0, %s38_s13), %s3987_s10 }
   0x8   : > { %s140_s15 = ssub.s32 %s3983_s9, %s4589_s12  ;;  %p152_p3 = por %p151_p2, %p150_p1 }
   0x9   : > { %p40_p4 = scmp.ge.s32.totalorder %s4591_s13, 2  ;;  %p141_p5 = scmp.eq.s32.totalorder %s140_s15, 0 }
   0xa   : > { %p3277_p6 = scmp.ge.s32.totalorder %s3991_s11, 4 }
   0xb   : > { %s4593_s13 = smov (%p40_p4, %s4591_s13), 0 }
   0xc   : > { %s4090_s16 = scalar_select %p141_p5, %s3971_s28, %s143_s14  }
   0xd   : > { %290 = sbr.rel (%p3277_p6) target bundleno = 28 (0x1c), region = 24 }
  0x14   : > { %319 = sbr.rel (!%p152_p3) target bundleno = 28 (0x1c), region = 36  ;;  %s321_s17 = sand.u32 (%p152_p3), 1, %s3971_s28  }
  0x15   : > { %s3443_s18 = smul.u32 (%p152_p3), 20, %s3983_s9 }
  0x16   : > { %s3775_s19 = smul.u32 (%p152_p3), 40, %s321_s17 }
  0x17   : > { %s326_s22 = scalar_lea.vmem (%p152_p3), %s4577_s4, %s3443_s18 }
  0x18   : > { %v341_v0 = vld [vmem:[%s326_s22] sm:$0xff] (%p152_p3)  ;;  %v343_v1 = vld [vmem:[%s326_s22 + $0x8] sm:$0xff] (%p152_p3)  ;;  %s323_s23 = scalar_lea.vmem (%p152_p3), [#allocation4], %s3775_s19  ;;  %v347_v3 = vld [vmem:[%s326_s22 + $0x30] sm:$0xff] (%p152_p3) }
  0x19   : > { %v345_v2 = vld [vmem:[%s326_s22 + $0x28] sm:$0xff] (%p152_p3)  ;;  %342 = vst [vmem:[%s323_s23] sm:$0xff] (%p152_p3), %v341_v0  ;;  %344 = vst [vmem:[%s323_s23 + $0x8] sm:$0xff] (%p152_p3), %v343_v1  ;;  %v3279_v4 = vld [vmem:[%s326_s22 + $0x10] sm:$0xf] (%p152_p3) }
  0x1a   : > { %346 = vst [vmem:[%s323_s23 + $0x14] sm:$0xff] (%p152_p3), %v345_v2  ;;  %v3281_v5 = vld [vmem:[%s326_s22 + $0x38] sm:$0xf] (%p152_p3)  ;;  %348 = vst [vmem:[%s323_s23 + $0x1c] sm:$0xff] (%p152_p3), %v347_v3 }
  0x1b   : > { %3280 = vst [vmem:[%s323_s23 + $0x10] sm:$0xf] %v3279_v4  ;;  %3282 = vst [vmem:[%s323_s23 + $0x24] sm:$0xf] %v3281_v5 }
  0x1c PF: > { %p3283_p7 = scmp.ge.s32.totalorder %s3991_s11, 1  ;;  %p382_p8 = scmp.lt.s32.totalorder %s3991_s11, 5 }
  0x1e   : > { %p383_p9 = pnand %p3283_p7, %p382_p8 }
  0x1f   : > { %v3836_v6 = vld [vmem:[%s4575_s2] sm:$0xff] (!%p383_p9)   ;;  %vm577_vm0 = vcmask (!%p383_p9), 1044480   ;;  %v3837_v7 = vld [vmem:[%s4575_s2 + $0x8] sm:$0x3f] (!%p383_p9)   ;;  %vm578_vm1 = vcmask (!%p383_p9), 1045504   ;;  %p460_p10 = scmp.lt.s32.totalorder (!%p383_p9), %s3979_s30, 1 }
  0x20   : > { %386 = sbr.rel (%p383_p9) target bundleno = 1086 (0x43e), region = 70  ;;  %3613 = vmatprep.subr.bf16.mxu0 (!%p383_p9), %v3836_v6  ;;  %v3993_v8 = vmov (!%p383_p9), 65535   ;;  %vm564_vm2 = vcmask (!%p383_p9), 220160   ;;  %s389_s23 = sand.u32 (!%p383_p9), 1, %s3967_s27   ;;  %vm701_vm3 = vcmask (!%p383_p9), 130048   ;;  %vm1369_vm4 = vcmask (!%p383_p9), 1043456  }
  0x21   : > { %3614 = vmatpush3.bf16.msra.mxu0 (!%p383_p9), %v3836_v6  ;;  %v579_v9 = vsel (!%p383_p9), %vm577_vm0, 4294967295, %v3993_v8  ;;  %s3776_s24 = smul.u32 (!%p383_p9), 40, %s389_s23  ;;  %vm1356_vm5 = vcmask (!%p383_p9), 72704   ;;  %vm3995_vm6 = vmmov (!%p383_p9), 0   ;;  %p494_p12 = scmp.lt.s32.totalorder (!%p383_p9), %s3975_s29, 1 }
  0x22   : > { %v580_v10 = vsel (!%p383_p9), %vm578_vm1, %v579_v9, 0  ;;  %s480_s14 = smul.u32 (!%p383_p9), 80, %s3975_s29 }
  0x23   : > { %v582_v11 = vand.u32 (!%p383_p9), %v3837_v7, %v580_v10  ;;  %s4122_s25 = scalar_lea.vmem (!%p383_p9), [#allocation4], %s3776_s24  ;;  %v1370_v10 = vsel (!%p383_p9), %vm1369_vm4, 4294967295, %v3993_v8 }
  0x24   : > { %v3842_v16 = vld [vmem:[%s4122_s25] ss:$20 sps:$4 sm:$0xff] (!%p383_p9)   ;;  %v3843_v17 = vld [vmem:[%s4122_s25 + $0x8] ss:$20 sps:$4 sm:$0xff] (!%p383_p9)   ;;  %v3844_v18 = vld [vmem:[%s4122_s25 + $0x4] ss:$20 sps:$4 sm:$0xff] (!%p383_p9)  }
  0x25   : > { %3615 = vmatprep.subr.bf16.mxu0 (!%p383_p9), %v582_v11  ;;  %3625 = vmatprep.subr.bf16.mxu1 (!%p383_p9), %v3842_v16  ;;  %v3845_v19 = vld [vmem:[%s4122_s25 + $0x10] ss:$20 sps:$4 sm:$0xff] (!%p383_p9)   ;;  %v3846_v62 = vld [vmem:[%s4122_s25 + $0xc] ss:$20 sps:$4 sm:$0xff] (!%p383_p9)   ;;  %p481_p11 = scmp.lt.s32.totalorder (!%p383_p9), %s480_s14, 159 }
  0x26   : > { %3616 = vmatpush3.bf16.msra.mxu0 (!%p383_p9), %v582_v11  ;;  %3626 = vmatpush3.bf16.msra.mxu1 (!%p383_p9), %v3842_v16  ;;  %v3847_v11 = vld [vmem:[%s4576_s3] sm:$0x1f] (!%p383_p9)  }
  0x27   : > { %s4595_s30 = smov (!%p460_p10, %s3979_s30), 1  ;;  %3645 = vmatprep.subr.bf16.mxu0 %v3843_v17  ;;  %3635 = vmatprep.subr.bf16.mxu1 %v3844_v18  ;;  %s4597_s14 = smov (!%p481_p11, %s480_s14), 159 }
  0x28   : > { %s3444_s15 = sshll.u32 %s4595_s30, 5  ;;  %s4599_s29 = smov (!%p494_p12, %s3975_s29), 1 }
  0x29   : > { %s467_s19 = scalar_lea.vmem %s4573_s0, %s3444_s15  ;;  %s4119_s22 = scalar_lea.vmem %s4574_s1, %s3444_s15 }
  0x2a   : > { %v3838_v12 = vld [vmem:[%s467_s19] sm:$0xff]   ;;  %v3839_v13 = vld [vmem:[%s467_s19 + $0x8] sm:$0xff]   ;;  %v3840_v14 = vld [vmem:[%s467_s19 + $0x10] sm:$0xff]   ;;  %s3288_s15 = sshll.u32 %s4597_s14, 2  ;;  %s3290_s23 = sshll.u32 %s4595_s30, 1 }
  0x2b   : > { %3617 = vmatprep.mubr.msk.bf16.mxu0 %vm564_vm2, %v3838_v12  ;;  %v3841_v15 = vld [vmem:[%s467_s19 + $0x18] sm:$0xff]   ;;  %v1371_v12 = vsel %vm577_vm0, %v1370_v10, 0  ;;  %v3848_v8 = vld [vmem:[%s4119_s22] sm:$0xff]   ;;  %s4177_s19 = scalar_lea.vmem %s4578_s5, %s3288_s15  ;;  %s4530_s24 = sadd.s32 %s3290_s23, %s4599_s29 }
  0x2c   : > { %3618 = vmatmul.mubr.msk.bf16.vlgmr.msra.gmra.mrb[0].mxu0 %vm564_vm2, %v3839_v13  ;;  %v1373_v13 = vand.u32 %v3847_v11, %v1371_v12  ;;  %v3851_v16 = vld [vmem:[%s4119_s22 + $0x18] sm:$0xff]   ;;  %s498_s26 = scalar_lea.vmem %s4580_s7, %s4530_s24  ;;  %s505_s14 = scalar_lea.vmem %s4581_s8, %s4530_s24 }
  0x2d   : > { %3621 = vmatprep.mubr.msk.bf16.mxu0 %vm564_vm2, %v3840_v14  ;;  %3646 = vmatpush3.bf16.msra.mxu0 %v3843_v17  ;;  %v3849_v14 = vld [vmem:[%s4119_s22 + $0x8] sm:$0xff]  }
  0x2e   : > { %3665 = vmatprep.subr.bf16.mxu0 %v3845_v19  ;;  %v3852_v17 = vld [vmem:[%s4122_s25] ss:$20 sps:$4 sm:$0xff]  }
  0x34   : > { %3622 = vmatmul.mubr.msk.bf16.gmra.mrb[4].mxu0 %vm564_vm2, %v3841_v15  ;;  %v3850_v15 = vld [vmem:[%s4119_s22 + $0x10] sm:$0xff]   ;;  %s4403_s22 = scalar_lea.vmem %s4579_s6, %s3288_s15 }
  0xff   : > { %v3619_v20 = vpop.f32.mrb[0].mxu0 }
 0x100   : > { %v651_v21 = vadd.f32 3.0, %v3619_v20  ;;  %v618_v22 = vpop.f32.mrb[1].mxu0 }
 0x101   : > { %v649_v23 = vadd.f32 3.0, %v618_v22  ;;  %v3620_v24 = vpop.f32.mrb[2].mxu0 }
 0x102   : > { %v659_v25 = vmax.f32 %v651_v21, 0.0  ;;  %v652_v26 = vadd.f32 3.0, %v3620_v24  ;;  %v621_v27 = vpop.f32.mrb[3].mxu0 }
 0x103   : > { %v657_v28 = vmax.f32 %v649_v23, 0.0  ;;  %v650_v29 = vadd.f32 3.0, %v621_v27 }
 0x104   : > { %v667_v30 = vmin.f32 %v659_v25, 6.0  ;;  %v660_v31 = vmax.f32 %v652_v26, 0.0 }
 0x105   : > { %v665_v32 = vmin.f32 %v657_v28, 6.0  ;;  %v658_v33 = vmax.f32 %v650_v29, 0.0 }
 0x106   : > { %v675_v34 = vmul.f32 %v3619_v20, %v667_v30  ;;  %v668_v35 = vmin.f32 %v660_v31, 6.0  ;;  %v4165_v20 = vld [vmem:[%s4122_s25 + $0xc] ss:$20 sps:$4 sm:$0xff]  }
 0x107   : > { %v673_v36 = vmul.f32 %v665_v32, %v618_v22  ;;  %v666_v37 = vmin.f32 %v658_v33, 6.0  ;;  %v3623_v38 = vpop.f32.mrb[4].mxu0 }
 0x108   : > { %v676_v39 = vmul.f32 %v3620_v24, %v668_v35  ;;  %v655_v40 = vadd.f32 3.0, %v3623_v38  ;;  %v634_v41 = vpop.f32.mrb[5].mxu0  ;;  %v683_v42 = vmul.f32 0.16666667, %v675_v34 }
 0x109   : > { %v674_v43 = vmul.f32 %v666_v37, %v621_v27  ;;  %v653_v44 = vadd.f32 3.0, %v634_v41  ;;  %v3624_v45 = vpop.f32.mrb[6].mxu0  ;;  %v681_v50 = vmul.f32 0.16666667, %v673_v36 }
 0x10a   : > { %v684_v46 = vmul.f32 0.16666667, %v676_v39  ;;  %v663_v47 = vmax.f32 %v655_v40, 0.0  ;;  %v656_v48 = vadd.f32 3.0, %v3624_v45  ;;  %v637_v49 = vpop.f32.mrb[7].mxu0 }
 0x10b   : > { %v682_v51 = vmul.f32 0.16666667, %v674_v43  ;;  %v661_v52 = vmax.f32 %v653_v44, 0.0  ;;  %v654_v53 = vadd.f32 3.0, %v637_v49 }
 0x10c   : > { %v690_v54 = vpack.c.bf16 %v684_v46, %v683_v42  ;;  %v671_v55 = vmin.f32 %v663_v47, 6.0  ;;  %v664_v56 = vmax.f32 %v656_v48, 0.0 }
 0x10d   : > { %v689_v57 = vpack.c.bf16 %v682_v51, %v681_v50  ;;  %v669_v58 = vmin.f32 %v661_v52, 6.0  ;;  %v662_v59 = vmax.f32 %v654_v53, 0.0 }
 0x10e   : > { %v679_v60 = vmul.f32 %v3623_v38, %v671_v55  ;;  %v672_v61 = vmin.f32 %v664_v56, 6.0 }
 0x10f   : > { %v677_v63 = vmul.f32 %v669_v58, %v634_v41  ;;  %v670_v0 = vmin.f32 %v662_v59, 6.0  ;;  %3627 = vmatprep.mubr.msk.bf16.mxu1 %vm701_vm3, %v689_v57  ;;  %3647 = vmatprep.mubr.msk.bf16.mxu0 %vm701_vm3, %v689_v57 }
 0x110   : > { %v680_v1 = vmul.f32 %v3624_v45, %v672_v61  ;;  %3628 = vmatmul.mubr.msk.bf16.vlgmr.msra.gmra.mrb[0].mxu1 %vm701_vm3, %v690_v54  ;;  %3648 = vmatmul.mubr.msk.bf16.vlgmr.msra.gmra.mrb[8].mxu0 %vm701_vm3, %v690_v54  ;;  %v687_v3 = vmul.f32 0.16666667, %v679_v60 }
 0x111   : > { %v678_v2 = vmul.f32 %v670_v0, %v637_v49  ;;  %3636 = vmatpush3.bf16.msra.mxu1 %v3844_v18  ;;  %3666 = vmatpush3.bf16.msra.mxu0 %v3845_v19  ;;  %v685_v5 = vmul.f32 0.16666667, %v677_v63  ;;  %v3853_v18 = vld [vmem:[%s4122_s25 + $0x4] ss:$20 sps:$4 sm:$0xff]   ;;  %v4161_v19 = vld [vmem:[%s4122_s25 + $0x8] ss:$20 sps:$4 sm:$0xff]  }
 0x112   : > { %v688_v4 = vmul.f32 0.16666667, %v680_v1  ;;  %3655 = vmatprep.subr.bf16.mxu1 %v3846_v62  ;;  %3685 = vmatprep.subr.bf16.mxu0 %v3852_v17 }
 0x113   : > { %v686_v6 = vmul.f32 0.16666667, %v678_v2 }
 0x114   : > { %v692_v7 = vpack.c.bf16 %v688_v4, %v687_v3 }
 0x115   : > { %v691_v9 = vpack.c.bf16 %v686_v6, %v685_v5 }
 0x117   : > { %3631 = vmatprep.mubr.msk.bf16.mxu1 %vm701_vm3, %v691_v9  ;;  %3651 = vmatprep.mubr.msk.bf16.mxu0 %vm701_vm3, %v691_v9 }
 0x118   : > { %3632 = vmatmul.mubr.msk.bf16.gmra.mrb[4].mxu1 %vm701_vm3, %v692_v7  ;;  %3652 = vmatmul.mubr.msk.bf16.gmra.mrb[12].mxu0 %vm701_vm3, %v692_v7 }
 0x119   : > { %3637 = vmatprep.mubr.msk.bf16.mxu1 %vm701_vm3, %v689_v57  ;;  %3667 = vmatprep.mubr.msk.bf16.mxu0 %vm701_vm3, %v689_v57 }
 0x120   : > { %3638 = vmatmul.mubr.msk.bf16.vlgmr.msra.gmra.mrb[8].mxu1 %vm701_vm3, %v690_v54  ;;  %3668 = vmatmul.mubr.msk.bf16.vlgmr.msra.gmra.mrb[16].mxu0 %vm701_vm3, %v690_v54 }
 0x121   : > { %3656 = vmatpush3.bf16.msra.mxu1 %v3846_v62  ;;  %3641 = vmatprep.mubr.msk.bf16.mxu1 %vm701_vm3, %v691_v9 }
 0x122   : > { %3671 = vmatprep.mubr.msk.bf16.mxu0 %vm701_vm3, %v691_v9  ;;  %3675 = vmatprep.subr.bf16.mxu1 %v1373_v13 }
 0x123   : > { %3686 = vmatpush3.bf16.msra.mxu0 %v3852_v17 }
 0x124   : > { %3705 = vmatprep.subr.bf16.mxu0 %v4161_v19 }
 0x128   : > { %3642 = vmatmul.mubr.msk.bf16.gmra.mrb[12].mxu1 %vm701_vm3, %v692_v7  ;;  %3672 = vmatmul.mubr.msk.bf16.gmra.mrb[20].mxu0 %vm701_vm3, %v692_v7 }
 0x129   : > { %3657 = vmatprep.mubr.msk.bf16.mxu1 %vm701_vm3, %v689_v57 }
 0x130   : > { %3658 = vmatmul.mubr.msk.bf16.vlgmr.msra.gmra.mrb[16].mxu1 %vm701_vm3, %v690_v54 }
 0x131   : > { %3676 = vmatpush3.bf16.msra.mxu1 %v1373_v13  ;;  %3661 = vmatprep.mubr.msk.bf16.mxu1 %vm701_vm3, %v691_v9 }
 0x132   : > { %3695 = vmatprep.subr.bf16.mxu1 %v3853_v18 }
 0x138   : > { %3662 = vmatmul.mubr.msk.bf16.gmra.mrb[20].mxu1 %vm701_vm3, %v692_v7 }
 0x139   : > { %3677 = vmatprep.mubr.msk.bf16.mxu1 %vm1356_vm5, %v3848_v8 }
 0x140   : > { %3678 = vmatmul.mubr.msk.bf16.vlgmr.msra.gmra.mrb[24].mxu1 %vm1356_vm5, %v3849_v14 }
 0x141   : > { %3681 = vmatprep.mubr.msk.bf16.mxu1 %vm1356_vm5, %v3850_v15  ;;  %3696 = vmatpush3.bf16.msra.mxu1 %v3853_v18 }
 0x142   : > { %3715 = vmatprep.subr.bf16.mxu1 %v4165_v20 }
 0x148   : > { %3682 = vmatmul.mubr.msk.bf16.gmra.mrb[28].mxu1 %vm1356_vm5, %v3851_v16 }
 0x1e3   : > { %v3629_v21 = vpop.f32.mrb[0].mxu1  ;;  %v3649_v22 = vpop.f32.mrb[8].mxu0 }
 0x1e4   : > { %v781_v23 = vadd.f32 3.0, %v3629_v21  ;;  %v1027_v24 = vadd.f32 3.0, %v3649_v22  ;;  %v748_v25 = vpop.f32.mrb[1].mxu1  ;;  %v994_v26 = vpop.f32.mrb[9].mxu0 }
 0x1e5   : > { %v779_v27 = vadd.f32 3.0, %v748_v25  ;;  %v1025_v28 = vadd.f32 3.0, %v994_v26  ;;  %v3630_v29 = vpop.f32.mrb[2].mxu1  ;;  %v3650_v30 = vpop.f32.mrb[10].mxu0 }
 0x1e6   : > { %v789_v31 = vmax.f32 %v781_v23, 0.0  ;;  %v1035_v32 = vmax.f32 %v1027_v24, 0.0  ;;  %v782_v33 = vadd.f32 3.0, %v3630_v29  ;;  %v1028_v34 = vadd.f32 3.0, %v3650_v30  ;;  %v751_v35 = vpop.f32.mrb[3].mxu1  ;;  %v997_v36 = vpop.f32.mrb[11].mxu0 }
 0x1e7   : > { %v787_v37 = vmax.f32 %v779_v27, 0.0  ;;  %v1033_v38 = vmax.f32 %v1025_v28, 0.0  ;;  %v780_v39 = vadd.f32 3.0, %v751_v35  ;;  %v1026_v40 = vadd.f32 3.0, %v997_v36 }
 0x1e8   : > { %v797_v41 = vmin.f32 %v789_v31, 6.0  ;;  %v1043_v42 = vmin.f32 %v1035_v32, 6.0  ;;  %v790_v43 = vmax.f32 %v782_v33, 0.0  ;;  %v1036_v44 = vmax.f32 %v1028_v34, 0.0 }
 0x1e9   : > { %v795_v45 = vmin.f32 %v787_v37, 6.0  ;;  %v1041_v46 = vmin.f32 %v1033_v38, 6.0  ;;  %v788_v47 = vmax.f32 %v780_v39, 0.0  ;;  %v1034_v48 = vmax.f32 %v1026_v40, 0.0 }
 0x1ea   : > { %v805_v49 = vmul.f32 %v3629_v21, %v797_v41  ;;  %v1051_v50 = vmul.f32 %v3649_v22, %v1043_v42  ;;  %v798_v51 = vmin.f32 %v790_v43, 6.0  ;;  %v1044_v52 = vmin.f32 %v1036_v44, 6.0 }
 0x1eb   : > { %v803_v53 = vmul.f32 %v795_v45, %v748_v25  ;;  %v1049_v54 = vmul.f32 %v1041_v46, %v994_v26  ;;  %v796_v55 = vmin.f32 %v788_v47, 6.0  ;;  %v1042_v56 = vmin.f32 %v1034_v48, 6.0  ;;  %v3633_v57 = vpop.f32.mrb[4].mxu1  ;;  %v3653_v58 = vpop.f32.mrb[12].mxu0 }
 0x1ec   : > { %v813_v59 = vmul.f32 0.16666667, %v805_v49  ;;  %v1059_v60 = vmul.f32 0.16666667, %v1051_v50  ;;  %v764_v61 = vpop.f32.mrb[5].mxu1  ;;  %v1010_v62 = vpop.f32.mrb[13].mxu0  ;;  %v806_v63 = vmul.f32 %v3630_v29, %v798_v51  ;;  %v1052_v0 = vmul.f32 %v3650_v30, %v1044_v52 }
 0x1ed   : > { %v804_v1 = vmul.f32 %v796_v55, %v751_v35  ;;  %v1050_v2 = vmul.f32 %v1042_v56, %v997_v36  ;;  %v4179_v3 = vpop.f32.mrb[6].mxu1  ;;  %v4181_v4 = vpop.f32.mrb[14].mxu0  ;;  %v811_v5 = vmul.f32 0.16666667, %v803_v53  ;;  %v1057_v6 = vmul.f32 0.16666667, %v1049_v54 }
 0x1ee   : > { %v785_v7 = vadd.f32 3.0, %v3633_v57  ;;  %v1031_v9 = vadd.f32 3.0, %v3653_v58  ;;  %v783_v12 = vadd.f32 3.0, %v764_v61  ;;  %v1029_v13 = vadd.f32 3.0, %v1010_v62  ;;  %v767_v17 = vpop.f32.mrb[7].mxu1  ;;  %v1013_v18 = vpop.f32.mrb[15].mxu0 }
 0x1ef   : > { %v812_v10 = vmul.f32 0.16666667, %v804_v1  ;;  %v1058_v11 = vmul.f32 0.16666667, %v1050_v2  ;;  %v786_v15 = vadd.f32 3.0, %v4179_v3  ;;  %v1032_v16 = vadd.f32 3.0, %v4181_v4 }
 0x1f0   : > { %v793_v8 = vmax.f32 %v785_v7, 0.0  ;;  %v1039_v14 = vmax.f32 %v1031_v9, 0.0  ;;  %v791_v23 = vmax.f32 %v783_v12, 0.0  ;;  %v1037_v24 = vmax.f32 %v1029_v13, 0.0 }
 0x1f1   : > { %v820_v21 = vadd.f32 %v812_v10, %v811_v5  ;;  %v1066_v22 = vadd.f32 %v1058_v11, %v1057_v6  ;;  %v814_v25 = vmul.f32 0.16666667, %v806_v63  ;;  %v1060_v26 = vmul.f32 0.16666667, %v1052_v0 }
 0x1f2   : > { %v801_v27 = vmin.f32 %v793_v8, 6.0  ;;  %v1047_v28 = vmin.f32 %v1039_v14, 6.0  ;;  %v799_v31 = vmin.f32 %v791_v23, 6.0  ;;  %v1045_v32 = vmin.f32 %v1037_v24, 6.0 }
 0x1f3   : > { %v821_v29 = vadd.f32 %v820_v21, %v813_v59  ;;  %v1067_v30 = vadd.f32 %v1066_v22, %v1059_v60  ;;  %v3639_v33 = vpop.f32.mrb[8].mxu1  ;;  %v4185_v34 = vpop.f32.mrb[16].mxu0  ;;  %v794_v35 = vmax.f32 %v786_v15, 0.0  ;;  %v1040_v36 = vmax.f32 %v1032_v16, 0.0 }
 0x1f4   : > { %v4187_v37 = vpop.f32.mrb[9].mxu1  ;;  %v4189_v38 = vpop.f32.mrb[17].mxu0  ;;  %v807_v39 = vmul.f32 %v799_v31, %v764_v61  ;;  %v1053_v41 = vmul.f32 %v1045_v32, %v1010_v62  ;;  %v809_v45 = vmul.f32 %v3633_v57, %v801_v27  ;;  %v1055_v46 = vmul.f32 %v3653_v58, %v1047_v28 }
 0x1f5   : > { %v822_v40 = vadd.f32 %v821_v29, %v814_v25  ;;  %v1068_v42 = vadd.f32 %v1067_v30, %v1060_v26  ;;  %v4191_v43 = vpop.f32.mrb[10].mxu1  ;;  %v4193_v44 = vpop.f32.mrb[18].mxu0  ;;  %v784_v51 = vadd.f32 3.0, %v767_v17  ;;  %v1030_v52 = vadd.f32 3.0, %v1013_v18 }
 0x1f6   : > { %v4195_v47 = vpop.f32.mrb[11].mxu1  ;;  %v4197_v48 = vpop.f32.mrb[19].mxu0  ;;  %v815_v49 = vmul.f32 0.16666667, %v807_v39  ;;  %v1061_v50 = vmul.f32 0.16666667, %v1053_v41 }
 0x1f7   : > { %v802_v53 = vmin.f32 %v794_v35, 6.0  ;;  %v1048_v54 = vmin.f32 %v1040_v36, 6.0  ;;  %v904_v55 = vadd.f32 3.0, %v3639_v33  ;;  %v1273_v56 = vadd.f32 3.0, %v4185_v34 }
 0x1f8   : > { %v823_v59 = vadd.f32 %v822_v40, %v815_v49  ;;  %v1069_v60 = vadd.f32 %v1068_v42, %v1061_v50  ;;  %v792_v61 = vmax.f32 %v784_v51, 0.0  ;;  %v1038_v62 = vmax.f32 %v1030_v52, 0.0 }
 0x1f9   : > { %v912_v63 = vmax.f32 %v904_v55, 0.0  ;;  %v1281_v57 = vmax.f32 %v1273_v56, 0.0  ;;  %v902_v58 = vadd.f32 3.0, %v4187_v37  ;;  %v1271_v0 = vadd.f32 3.0, %v4189_v38 }
 0x1fa   : > { %v800_v1 = vmin.f32 %v792_v61, 6.0  ;;  %v1046_v2 = vmin.f32 %v1038_v62, 6.0  ;;  %v905_v5 = vadd.f32 3.0, %v4191_v43  ;;  %v1274_v6 = vadd.f32 3.0, %v4193_v44 }
 0x1fb   : > { %v4204_v7 = vpop.f32.mrb[12].mxu1  ;;  %v4206_v9 = vpop.f32.mrb[20].mxu0  ;;  %v810_v10 = vmul.f32 %v4179_v3, %v802_v53  ;;  %v1056_v11 = vmul.f32 %v4181_v4, %v1048_v54  ;;  %v920_v12 = vmin.f32 %v912_v63, 6.0  ;;  %v910_v13 = vmax.f32 %v902_v58, 0.0 }
 0x1fc   : > { %v4210_v8 = vpop.f32.mrb[13].mxu1  ;;  %v4212_v14 = vpop.f32.mrb[21].mxu0  ;;  %v808_v15 = vmul.f32 %v800_v1, %v767_v17  ;;  %v1054_v16 = vmul.f32 %v1046_v2, %v1013_v18  ;;  %v1289_v21 = vmin.f32 %v1281_v57, 6.0  ;;  %v1279_v22 = vmax.f32 %v1271_v0, 0.0 }
 0x1fd   : > { %v4214_v23 = vpop.f32.mrb[14].mxu1  ;;  %v4216_v24 = vpop.f32.mrb[22].mxu0  ;;  %v817_v25 = vmul.f32 0.16666667, %v809_v45  ;;  %v913_v26 = vmax.f32 %v905_v5, 0.0  ;;  %v1282_v27 = vmax.f32 %v1274_v6, 0.0  ;;  %v928_v30 = vmul.f32 %v3639_v33, %v920_v12 }
 0x1fe   : > { %v4218_v3 = vpop.f32.mrb[15].mxu1  ;;  %v4220_v4 = vpop.f32.mrb[23].mxu0  ;;  %v816_v28 = vmul.f32 0.16666667, %v808_v15  ;;  %v1062_v29 = vmul.f32 0.16666667, %v1054_v16  ;;  %v1297_v39 = vmul.f32 %v4185_v34, %v1289_v21 }
 0x1ff   : > { %v918_v31 = vmin.f32 %v910_v13, 6.0  ;;  %v1063_v32 = vmul.f32 0.16666667, %v1055_v46  ;;  %v818_v17 = vmul.f32 0.16666667, %v810_v10  ;;  %v1287_v40 = vmin.f32 %v1279_v22, 6.0 }
 0x200   : > { %v1064_v18 = vmul.f32 0.16666667, %v1056_v11  ;;  %v824_v35 = vadd.f32 %v823_v59, %v816_v28  ;;  %v1070_v36 = vadd.f32 %v1069_v60, %v1062_v29  ;;  %v921_v41 = vmin.f32 %v913_v26, 6.0 }
 0x201   : > { %v1290_v42 = vmin.f32 %v1282_v27, 6.0  ;;  %v903_v45 = vadd.f32 3.0, %v4195_v47  ;;  %v1272_v49 = vadd.f32 3.0, %v4197_v48  ;;  %v936_v52 = vmul.f32 0.16666667, %v928_v30 }
 0x202   : > { %v825_v50 = vadd.f32 %v824_v35, %v817_v25  ;;  %v1071_v51 = vadd.f32 %v1070_v36, %v1063_v32  ;;  %v926_v33 = vmul.f32 %v918_v31, %v4187_v37  ;;  %v908_v55 = vadd.f32 3.0, %v4204_v7 }
 0x203   : > { %v4226_v53 = vpop.f32.mrb[16].mxu1  ;;  %v911_v46 = vmax.f32 %v903_v45, 0.0  ;;  %v1280_v54 = vmax.f32 %v1272_v49, 0.0  ;;  %v1277_v34 = vadd.f32 3.0, %v4206_v9  ;;  %v906_v61 = vadd.f32 3.0, %v4210_v8 }
 0x204   : > { %v4230_v56 = vpop.f32.mrb[17].mxu1  ;;  %v4232_v59 = vadd.f32 %v825_v50, %v818_v17  ;;  %v4234_v60 = vadd.f32 %v1071_v51, %v1064_v18  ;;  %v1275_v62 = vadd.f32 3.0, %v4212_v14  ;;  %v1295_v37 = vmul.f32 %v1287_v40, %v4189_v38 }
 0x205   : > { %v4238_v63 = vpop.f32.mrb[18].mxu1  ;;  %v919_v57 = vmin.f32 %v911_v46, 6.0  ;;  %v1288_v58 = vmin.f32 %v1280_v54, 6.0  ;;  %v916_v0 = vmax.f32 %v908_v55, 0.0  ;;  %v929_v2 = vmul.f32 %v4191_v43, %v921_v41 }
 0x206   : > { %v4241_v1 = vpop.f32.mrb[19].mxu1  ;;  %v1285_v5 = vmax.f32 %v1277_v34, 0.0  ;;  %v914_v6 = vmax.f32 %v906_v61, 0.0  ;;  %v1283_v10 = vmax.f32 %v1275_v62, 0.0  ;;  %v1298_v11 = vmul.f32 %v4193_v44, %v1290_v42 }
 0x207   : > { %v927_v12 = vmul.f32 %v919_v57, %v4195_v47  ;;  %v1296_v13 = vmul.f32 %v1288_v58, %v4197_v48  ;;  %v924_v15 = vmin.f32 %v916_v0, 6.0  ;;  %v1305_v16 = vmul.f32 0.16666667, %v1297_v39 }
 0x208   : > { %v934_v21 = vmul.f32 0.16666667, %v926_v33  ;;  %v922_v38 = vmin.f32 %v914_v6, 6.0  ;;  %v1291_v22 = vmin.f32 %v1283_v10, 6.0  ;;  %v1303_v25 = vmul.f32 0.16666667, %v1295_v37 }
 0x209   : > { %v935_v26 = vmul.f32 0.16666667, %v927_v12  ;;  %v1304_v27 = vmul.f32 0.16666667, %v1296_v13  ;;  %v932_v28 = vmul.f32 %v4204_v7, %v924_v15  ;;  %v1293_v43 = vmin.f32 %v1285_v5, 6.0 }
 0x20a   : > { %v930_v29 = vmul.f32 %v922_v38, %v4210_v8  ;;  %v1299_v30 = vmul.f32 %v1291_v22, %v4212_v14  ;;  %v937_v47 = vmul.f32 0.16666667, %v929_v2  ;;  %v1306_v31 = vmul.f32 0.16666667, %v1298_v11 }
 0x20b   : > { %v4250_v44 = vpop.f32.mrb[20].mxu1  ;;  %v943_v48 = vadd.f32 %v935_v26, %v934_v21  ;;  %v1312_v32 = vadd.f32 %v1304_v27, %v1303_v25  ;;  %v909_v7 = vadd.f32 3.0, %v4214_v23  ;;  %v1278_v8 = vadd.f32 3.0, %v4216_v24 }
 0x20c   : > { %v4252_v17 = vpop.f32.mrb[21].mxu1  ;;  %v938_v18 = vmul.f32 0.16666667, %v930_v29  ;;  %v1307_v35 = vmul.f32 0.16666667, %v1299_v30  ;;  %v1301_v42 = vmul.f32 %v4206_v9, %v1293_v43  ;;  %v907_v45 = vadd.f32 3.0, %v4218_v3 }
 0x20d   : > { %v4254_v36 = vpop.f32.mrb[22].mxu1  ;;  %v944_v39 = vadd.f32 %v943_v48, %v936_v52  ;;  %v1313_v40 = vadd.f32 %v1312_v32, %v1305_v16  ;;  %v940_v14 = vmul.f32 0.16666667, %v932_v28  ;;  %v1276_v49 = vadd.f32 3.0, %v4220_v4 }
 0x20e   : > { %v4258_v41 = vpop.f32.mrb[23].mxu1  ;;  %v917_v33 = vmax.f32 %v909_v7, 0.0  ;;  %v1286_v46 = vmax.f32 %v1278_v8, 0.0  ;;  %v915_v54 = vmax.f32 %v907_v45, 0.0  ;;  %v1150_v55 = vadd.f32 3.0, %v4226_v53 }
 0x20f   : > { %v945_v50 = vadd.f32 %v944_v39, %v937_v47  ;;  %v1314_v51 = vadd.f32 %v1313_v40, %v1306_v31  ;;  %v1284_v52 = vmax.f32 %v1276_v49, 0.0  ;;  %v1148_v34 = vadd.f32 3.0, %v4230_v56 }
 0x210   : > { %v925_v37 = vmin.f32 %v917_v33, 6.0  ;;  %v1294_v57 = vmin.f32 %v1286_v46, 6.0  ;;  %v923_v58 = vmin.f32 %v915_v54, 6.0  ;;  %v1158_v0 = vmax.f32 %v1150_v55, 0.0 }
 0x211   : > { %v946_v61 = vadd.f32 %v945_v50, %v938_v18  ;;  %v1315_v62 = vadd.f32 %v1314_v51, %v1307_v35  ;;  %v1292_v9 = vmin.f32 %v1284_v52, 6.0  ;;  %v1156_v2 = vmax.f32 %v1148_v34, 0.0 }
 0x212   : > { %v933_v6 = vmul.f32 %v4214_v23, %v925_v37  ;;  %v1302_v10 = vmul.f32 %v4216_v24, %v1294_v57  ;;  %v1151_v11 = vadd.f32 3.0, %v4238_v63  ;;  %v1149_v12 = vadd.f32 3.0, %v4241_v1 }
 0x213   : > { %v4265_v5 = vpop.f32.mrb[24].mxu1  ;;  %v931_v15 = vmul.f32 %v923_v58, %v4218_v3  ;;  %v1300_v16 = vmul.f32 %v1292_v9, %v4220_v4  ;;  %v1166_v21 = vmin.f32 %v1158_v0, 6.0  ;;  %v1164_v38 = vmin.f32 %v1156_v2, 6.0 }
 0x214   : > { %v4271_v13 = vpop.f32.mrb[25].mxu1  ;;  %v1309_v25 = vmul.f32 0.16666667, %v1301_v42  ;;  %v941_v26 = vmul.f32 0.16666667, %v933_v6  ;;  %v1159_v27 = vmax.f32 %v1151_v11, 0.0 }
 0x215   : > { %v4275_v22 = vpop.f32.mrb[26].mxu1  ;;  %v1157_v23 = vmax.f32 %v1149_v12, 0.0  ;;  %v939_v28 = vmul.f32 0.16666667, %v931_v15  ;;  %v1308_v24 = vmul.f32 0.16666667, %v1300_v16  ;;  %v1174_v43 = vmul.f32 %v4226_v53, %v1166_v21 }
 0x216   : > { %v1172_v29 = vmul.f32 %v1164_v38, %v4230_v56  ;;  %v4279_v30 = vpop.f32.mrb[27].mxu1  ;;  %v1167_v47 = vmin.f32 %v1159_v27, 6.0  ;;  %v1154_v4 = vadd.f32 3.0, %v4250_v44  ;;  %v1152_v31 = vadd.f32 3.0, %v4252_v17 }
 0x217   : > { %v1165_v3 = vmin.f32 %v1157_v23, 6.0  ;;  %v1310_v48 = vmul.f32 0.16666667, %v1302_v10  ;;  %v947_v32 = vadd.f32 %v946_v61, %v939_v28  ;;  %v1316_v18 = vadd.f32 %v1315_v62, %v1308_v24 }
 0x218   : > { %v1182_v35 = vmul.f32 0.16666667, %v1174_v43  ;;  %v1180_v39 = vmul.f32 0.16666667, %v1172_v29  ;;  %v1162_v7 = vmax.f32 %v1154_v4, 0.0  ;;  %v1160_v8 = vmax.f32 %v1152_v31, 0.0 }
 0x219   : > { %v1173_v40 = vmul.f32 %v1165_v3, %v4241_v1  ;;  %v948_v53 = vadd.f32 %v947_v32, %v940_v14  ;;  %v1317_v42 = vadd.f32 %v1316_v18, %v1309_v25  ;;  %v1155_v56 = vadd.f32 3.0, %v4254_v36 }
 0x21a   : > { %v1153_v45 = vadd.f32 3.0, %v4258_v41  ;;  %v1175_v50 = vmul.f32 %v4238_v63, %v1167_v47  ;;  %v1170_v33 = vmin.f32 %v1162_v7, 6.0  ;;  %v1168_v46 = vmin.f32 %v1160_v8, 6.0 }
 0x21b   : > { %v3683_v49 = vpop.f32.mrb[28].mxu1  ;;  %v1181_v51 = vmul.f32 0.16666667, %v1173_v40  ;;  %v4287_v54 = vadd.f32 %v948_v53, %v941_v26  ;;  %v4289_v52 = vadd.f32 %v1317_v42, %v1310_v48  ;;  %v1163_v55 = vmax.f32 %v1155_v56, 0.0 }
 0x21c   : > { %v1161_v1 = vmax.f32 %v1153_v45, 0.0  ;;  %v1425_v34 = vpop.f32.mrb[29].mxu1  ;;  %v1178_v14 = vmul.f32 %v4250_v44, %v1170_v33  ;;  %v1176_v62 = vmul.f32 %v1168_v46, %v4252_v17  ;;  %v1442_v37 = vadd.f32 3.0, %v4265_v5 }
 0x21d   : > { %v1189_v61 = vadd.f32 %v1181_v51, %v1180_v39  ;;  %v3684_v57 = vpop.f32.mrb[30].mxu1  ;;  %v1171_v58 = vmin.f32 %v1163_v55, 6.0  ;;  %v1183_v0 = vmul.f32 0.16666667, %v1175_v50  ;;  %v1440_v16 = vadd.f32 3.0, %v4271_v13 }
 0x21e   : > { %v1169_v63 = vmin.f32 %v1161_v1, 6.0  ;;  %v1428_v9 = vpop.f32.mrb[31].mxu1  ;;  %v1184_v6 = vmul.f32 0.16666667, %v1176_v62  ;;  %v1450_v10 = vmax.f32 %v1442_v37, 0.0  ;;  %v1443_v17 = vadd.f32 3.0, %v4275_v22 }
 0x21f   : > { %v1190_v2 = vadd.f32 %v1189_v61, %v1182_v35  ;;  %v1186_v11 = vmul.f32 0.16666667, %v1178_v14  ;;  %v1179_v12 = vmul.f32 %v4254_v36, %v1171_v58  ;;  %v1441_v38 = vadd.f32 3.0, %v4279_v30  ;;  %v3856_v62 = vld [vmem:[%s4122_s25 + $0x10] ss:$20 sps:$4 sm:$0xff]  }
 0x220   : > { %v1177_v15 = vmul.f32 %v1169_v63, %v4258_v41  ;;  %v1458_v21 = vmin.f32 %v1450_v10, 6.0  ;;  %v1448_v27 = vmax.f32 %v1440_v16, 0.0  ;;  %v1451_v24 = vmax.f32 %v1443_v17, 0.0  ;;  %v3857_v63 = vld [vmem:[%s4177_s19 + $0x40] sm:$0xff]   ;;  %v3861_v17 = vld [vmem:[%s4177_s19 + $0x50] sm:$0xff]  }
 0x221   : > { %v1191_v44 = vadd.f32 %v1190_v2, %v1183_v0  ;;  %v1187_v25 = vmul.f32 0.16666667, %v1179_v12  ;;  %v1449_v43 = vmax.f32 %v1441_v38, 0.0  ;;  %v1446_v36 = vadd.f32 3.0, %v3683_v49  ;;  %v3858_v10 = vld [vmem:[%s4177_s19] sm:$0xff]  }
 0x222   : > { %v1185_v26 = vmul.f32 0.16666667, %v1177_v15  ;;  %v1466_v28 = vmul.f32 %v4265_v5, %v1458_v21  ;;  %v1456_v29 = vmin.f32 %v1448_v27, 6.0  ;;  %v1444_v47 = vadd.f32 3.0, %v1425_v34  ;;  %v3866_v12 = vld [vmem:[%s4177_s19 + $0xc0] sm:$0xff]  }
 0x223   : > { %v1192_v23 = vadd.f32 %v1191_v44, %v1184_v6  ;;  %v1447_v41 = vadd.f32 3.0, %v3684_v57  ;;  %v1459_v31 = vmin.f32 %v1451_v24, 6.0  ;;  %v1457_v48 = vmin.f32 %v1449_v43, 6.0  ;;  %v3860_v44 = vld [vmem:[%s4177_s19 + $0x8] sm:$0xff]   ;;  %v3864_v43 = vld [vmem:[%s4177_s19 + $0x18] sm:$0xff]  }
 0x224   : > { %v1474_v4 = vmul.f32 0.16666667, %v1466_v28  ;;  %v1464_v32 = vmul.f32 %v1456_v29, %v4271_v13  ;;  %v1454_v18 = vmax.f32 %v1446_v36, 0.0  ;;  %v1452_v35 = vmax.f32 %v1444_v47, 0.0  ;;  %v3867_v47 = vld [vmem:[%s4177_s19 + $0x20] sm:$0xff]  }
 0x225   : > { %v1193_v3 = vadd.f32 %v1192_v23, %v1185_v26  ;;  %v1455_v39 = vmax.f32 %v1447_v41, 0.0  ;;  %v1467_v7 = vmul.f32 %v4275_v22, %v1459_v31  ;;  %v1465_v5 = vmul.f32 %v1457_v48, %v4279_v30  ;;  %v3862_v26 = vld [vmem:[%s4177_s19 + $0x10] sm:$0xff]   ;;  %v3863_v23 = vld [vmem:[%s4177_s19 + $0x58] sm:$0xff]   ;;  %v3868_v41 = vld [vmem:[%s4177_s19 + $0x80] sm:$0xff]  }
 0x226   : > { %v1445_v8 = vadd.f32 3.0, %v1428_v9  ;;  %v1472_v53 = vmul.f32 0.16666667, %v1464_v32  ;;  %v1462_v42 = vmin.f32 %v1454_v18, 6.0  ;;  %v1460_v56 = vmin.f32 %v1452_v35, 6.0  ;;  %v3870_v31 = vld [vmem:[%s4177_s19 + $0xc8] sm:$0xff]  }
 0x227   : > { %v1194_v40 = vadd.f32 %v1193_v3, %v1186_v11  ;;  %v1463_v45 = vmin.f32 %v1455_v39, 6.0  ;;  %v1475_v51 = vmul.f32 0.16666667, %v1467_v7  ;;  %v1473_v33 = vmul.f32 0.16666667, %v1465_v5  ;;  %v3859_v11 = vld [vmem:[%s4177_s19 + $0x48] sm:$0xff]  }
 0x228   : > { %v1453_v46 = vmax.f32 %v1445_v8, 0.0  ;;  %v2125_v13 = vrot.slane %v4287_v54, 4  ;;  %v1470_v55 = vmul.f32 %v3683_v49, %v1462_v42  ;;  %v1468_v14 = vmul.f32 %v1460_v56, %v1425_v34  ;;  %v3871_v32 = vld [vmem:[%s4177_s19 + $0x28] sm:$0xff]   ;;  %v3874_v7 = vld [vmem:[%s4177_s19 + $0xd0] sm:$0xff]   ;;  %v3877_v56 = vld [vmem:[%s4177_s19 + $0x78] sm:$0xff]  }
 0x229   : > { %v1195_v50 = vadd.f32 %v1194_v40, %v1187_v25  ;;  %v1471_v1 = vmul.f32 %v3684_v57, %v1463_v45  ;;  %v4304_v61 = vpack.c.bf16 %v1475_v51, %v1474_v4  ;;  %v1480_v22 = vpack.c.bf16 %v1473_v33, %v1472_v53  ;;  %v3869_v4 = vld [vmem:[%s4177_s19 + $0x68] sm:$0xff]   ;;  %v3873_v40 = vld [vmem:[%s4177_s19 + $0x70] sm:$0xff]   ;;  %v3879_v33 = vld [vmem:[%s4177_s19 + $0x38] sm:$0xff]  }
 0x22a   : > { %v1461_v30 = vmin.f32 %v1453_v46, 6.0  ;;  %v1478_v37 = vmul.f32 0.16666667, %v1470_v55  ;;  %v2126_v49 = vadd.f32 %v2125_v13, %v4287_v54  ;;  %v1476_v34 = vmul.f32 0.16666667, %v1468_v14  ;;  %v3872_v18 = vld [vmem:[%s4177_s19 + $0x88] sm:$0xff]  }
 0x22b   : > { %v1479_v58 = vmul.f32 0.16666667, %v1471_v1  ;;  %3687 = vmatprep.mubr.msk.bf16.mxu0 %vm701_vm3, %v1480_v22  ;;  %3697 = vmatprep.mubr.msk.bf16.mxu1 %vm701_vm3, %v1480_v22  ;;  %v2119_v21 = vrot.slane %v4232_v59, 4  ;;  %v2131_v39 = vrot.slane %v4234_v60, 4  ;;  %v3875_v8 = vld [vmem:[%s4177_s19 + $0x30] sm:$0xff]   ;;  %v3880_v46 = vld [vmem:[%s4177_s19 + $0x98] sm:$0xff]  }
 0x22c   : > { %v1469_v0 = vmul.f32 %v1461_v30, %v1428_v9  ;;  %3688 = vmatmul.mubr.msk.bf16.vlgmr.msra.gmra.mrb[24].mxu0 %vm701_vm3, %v4304_v61  ;;  %3698 = vmatmul.mubr.msk.bf16.vlgmr.msra.gmra.mrb[32].mxu1 %vm701_vm3, %v4304_v61  ;;  %v2127_v6 = vrot.slane %v2126_v49, 2  ;;  %v3876_v53 = vld [vmem:[%s4177_s19 + $0x90] sm:$0xff]   ;;  %v3881_v55 = vld [vmem:[%s4177_s19 + $0xe0] sm:$0xff]   ;;  %v3994_v30 = vmov 0.0  }
 0x22d   : > { %v4310_v2 = vpack.c.bf16 %v1479_v58, %v1478_v37  ;;  %3706 = vmatpush3.bf16.msra.mxu0 %v4161_v19  ;;  %3716 = vmatpush3.bf16.msra.mxu1 %v4165_v20  ;;  %v2137_v20 = vrot.slane %v1195_v50, 4  ;;  %v2120_v27 = vadd.f32 %v2119_v21, %v4232_v59  ;;  %v3865_v59 = vld [vmem:[%s4177_s19 + $0x60] sm:$0xff]   ;;  %v2132_v42 = vadd.f32 %v2131_v39, %v4234_v60  ;;  %v3885_v37 = vld [vmem:[%s4177_s19 + $0xa8] sm:$0xff]   ;;  %v3915_v39 = vld [vmem:[%s4403_s22 + $0xd0] sm:$0xff]  }
 0x22e   : > { %v1477_v57 = vmul.f32 0.16666667, %v1469_v0  ;;  %3725 = vmatprep.subr.bf16.mxu0 %v3856_v62  ;;  %3507 = vmatprep.subr.bf16.mxu1 %v3857_v63  ;;  %v2128_v19 = vadd.f32 %v2127_v6, %v2126_v49  ;;  %v3882_v1 = vld [vmem:[%s4177_s19 + $0xa0] sm:$0xff]   ;;  %v3886_v58 = vld [vmem:[%s4177_s19 + $0x108] sm:$0xff]   ;;  %v2143_v0 = vrot.slane %v4289_v52, 4  ;;  %v3888_v49 = vld [vmem:[%s4177_s19 + $0xb0] sm:$0xff]  }
 0x22f   : > { %v2138_v16 = vadd.f32 %v2137_v20, %v1195_v50  ;;  %v2121_v29 = vrot.slane %v2120_v27, 2  ;;  %v3878_v50 = vld [vmem:[%s4177_s19 + $0xd8] sm:$0xff]   ;;  %v2133_v13 = vrot.slane %v2132_v42, 2 }
 0x230   : > { %v1482_v9 = vpack.c.bf16 %v1477_v57, %v1476_v34  ;;  %v2129_v54 = vrot.slane %v2128_v19, 1  ;;  %v3889_v34 = vld [vmem:[%s4177_s19 + $0x110] sm:$0xff]   ;;  %v2144_v57 = vadd.f32 %v2143_v0, %v4289_v52  ;;  %v3892_v20 = vld [vmem:[%s4177_s19 + $0x118] sm:$0xff]   ;;  %v3893_v52 = vld [vmem:[%s4177_s19 + $0x120] sm:$0xff]  }
 0x231   : > { %v2139_v25 = vrot.slane %v2138_v16, 2  ;;  %v2122_v3 = vadd.f32 %v2121_v29, %v2120_v27  ;;  %v3898_v27 = vld [vmem:[%s4403_s22] sm:$0xff]   ;;  %v3903_v29 = vld [vmem:[%s4403_s22 + $0x58] sm:$0xff]  }
 0x232   : > { %3691 = vmatprep.mubr.msk.bf16.mxu0 %vm701_vm3, %v1482_v9  ;;  %3701 = vmatprep.mubr.msk.bf16.mxu1 %vm701_vm3, %v1482_v9  ;;  %v2130_v15 = vadd.f32 %v2129_v54, %v2128_v19  ;;  %v3891_v19 = vld [vmem:[%s4177_s19 + $0xb8] sm:$0xff]   ;;  %v2145_v54 = vrot.slane %v2144_v57, 2 }
 0x233   : > { %v2140_v24 = vadd.f32 %v2139_v25, %v2138_v16  ;;  %v2123_v35 = vrot.slane %v2122_v3, 1 }
 0x234   : > { %3692 = vmatmul.mubr.msk.bf16.gmra.mrb[28].mxu0 %vm701_vm3, %v4310_v2  ;;  %3702 = vmatmul.mubr.msk.bf16.gmra.mrb[36].mxu1 %vm701_vm3, %v4310_v2  ;;  %v2150_v38 = vmul.f32 0.015625, %v2130_v15  ;;  %v3894_v15 = vld [vmem:[%s4177_s19 + $0x128] sm:$0xff]  }
 0x235   : > { %3707 = vmatprep.mubr.msk.bf16.mxu0 %vm701_vm3, %v1480_v22  ;;  %3717 = vmatprep.mubr.msk.bf16.mxu1 %vm701_vm3, %v1480_v22  ;;  %v2141_v36 = vrot.slane %v2140_v24, 1  ;;  %v2124_v45 = vadd.f32 %v2123_v35, %v2122_v3  ;;  %v3908_v3 = vld [vmem:[%s4403_s22 + $0x80] sm:$0xff]   ;;  %v3914_v35 = vld [vmem:[%s4403_s22 + $0x30] sm:$0xff]  }
 0x236   : > { %v2195_v28 = vpack.c.bf16 %v2150_v38, %v2150_v38 }
 0x237   : > { %v2142_v48 = vadd.f32 %v2141_v36, %v2140_v24  ;;  %v2149_v60 = vmul.f32 0.015625, %v2124_v45  ;;  %v3901_v24 = vld [vmem:[%s4403_s22 + $0x50] sm:$0xff]   ;;  %v3905_v36 = vld [vmem:[%s4403_s22 + $0x60] sm:$0xff]   ;;  %v3924_v45 = vld [vmem:[%s4403_s22 + $0xe8] sm:$0xff]  }
 0x239   : > { %v2152_v5 = vmul.f32 0.015625, %v2142_v48  ;;  %v2194_v14 = vpack.c.bf16 %v2149_v60, %v2149_v60  ;;  %v3911_v48 = vld [vmem:[%s4403_s22 + $0xc8] sm:$0xff]  }
 0x23b   : > { %v2197_v51 = vpack.c.bf16 %v2152_v5, %v2152_v5  ;;  %v3918_v5 = vld [vmem:[%s4403_s22 + $0x38] sm:$0xff]  }
 0x23c   : > { %3708 = vmatmul.mubr.msk.bf16.vlgmr.msra.gmra.mrb[32].mxu0 %vm701_vm3, %v4304_v61  ;;  %3718 = vmatmul.mubr.msk.bf16.vlgmr.msra.gmra.mrb[40].mxu1 %vm701_vm3, %v4304_v61 }
 0x23d   : > { %3726 = vmatpush3.bf16.msra.mxu0 %v3856_v62  ;;  %3508 = vmatpush3.bf16.msra.mxu1 %v3858_v10  ;;  %v3884_v62 = vld [vmem:[%s4177_s19 + $0xe8] sm:$0xff]  }
 0x23e   : > { %3711 = vmatprep.mubr.msk.bf16.mxu0 %vm701_vm3, %v1482_v9  ;;  %3721 = vmatprep.mubr.msk.bf16.mxu1 %vm701_vm3, %v1482_v9 }
 0x23f   : > { %3509 = vmatprep.subr.bf16.mxu1 %v3859_v11  ;;  %3529 = vmatprep.subr.bf16.mxu0 %v3866_v12  ;;  %v2146_v12 = vadd.f32 %v2145_v54, %v2144_v57 }
 0x241   : > { %3510 = vmatpush3.bf16.msra.mxu1 %v3860_v44  ;;  %v2147_v16 = vrot.slane %v2146_v12, 1  ;;  %v3895_v44 = vld [vmem:[%s4177_s19 + $0x130] sm:$0xff]  }
 0x242   : > { %3511 = vmatprep.subr.bf16.mxu1 %v3861_v17  ;;  %v3896_v17 = vld [vmem:[%s4177_s19 + $0x138] sm:$0xff]  }
 0x243   : > { %v2148_v21 = vadd.f32 %v2147_v16, %v2146_v12 }
 0x244   : > { %3712 = vmatmul.mubr.msk.bf16.gmra.mrb[36].mxu0 %vm701_vm3, %v4310_v2  ;;  %3722 = vmatmul.mubr.msk.bf16.gmra.mrb[44].mxu1 %vm701_vm3, %v4310_v2 }
 0x245   : > { %3512 = vmatpush3.bf16.msra.mxu1 %v3862_v26  ;;  %3727 = vmatprep.mubr.msk.bf16.mxu0 %vm701_vm3, %v1480_v22  ;;  %v2134_v22 = vadd.f32 %v2133_v13, %v2132_v42  ;;  %v2153_v38 = vmul.f32 0.015625, %v2148_v21  ;;  %v3897_v26 = vld [vmem:[%s4403_s22 + $0x40] sm:$0xff]   ;;  %v3932_v13 = vld [vmem:[%s4403_s22 + $0xb8] sm:$0xff]  }
 0x246   : > { %2551 = vmatprep.mubr.bf16.mxu1 %v2195_v28  ;;  %3513 = vmatprep.subr.bf16.mxu1 %v3863_v23  ;;  %v3899_v23 = vld [vmem:[%s4403_s22 + $0x48] sm:$0xff]   ;;  %v3921_v42 = vld [vmem:[%s4403_s22 + $0xe0] sm:$0xff]  }
 0x247   : > { %v2135_v63 = vrot.slane %v2134_v22, 1  ;;  %v2198_v25 = vpack.c.bf16 %v2153_v38, %v2153_v38  ;;  %v3900_v28 = vld [vmem:[%s4403_s22 + $0x8] sm:$0xff]  }
 0x249   : > { %3514 = vmatpush3.bf16.msra.mxu1 %v3864_v43  ;;  %v2136_v6 = vadd.f32 %v2135_v63, %v2134_v22  ;;  %v3902_v43 = vld [vmem:[%s4403_s22 + $0x10] sm:$0xff]  }
 0x24a   : > { %3515 = vmatprep.subr.bf16.mxu1 %v3865_v59  ;;  %v3904_v59 = vld [vmem:[%s4403_s22 + $0x18] sm:$0xff]  }
 0x24b   : > { %v2151_v10 = vmul.f32 0.015625, %v2136_v6 }
 0x24c   : > { %3728 = vmatmul.mubr.msk.bf16.vlgmr.msra.gmra.mrb[40].mxu0 %vm701_vm3, %v4304_v61  ;;  %v3883_v61 = vld [vmem:[%s4177_s19 + $0x100] sm:$0xff]  }
 0x24d   : > { %3516 = vmatpush3.bf16.msra.mxu1 %v3867_v47  ;;  %3530 = vmatpush3.bf16.msra.mxu0 %v3868_v41  ;;  %v2196_v11 = vpack.c.bf16 %v2151_v10, %v2151_v10  ;;  %v3906_v47 = vld [vmem:[%s4403_s22 + $0x20] sm:$0xff]  }
 0x24e   : > { %3731 = vmatprep.mubr.msk.bf16.mxu0 %vm701_vm3, %v1482_v9  ;;  %3517 = vmatprep.subr.bf16.mxu1 %v3869_v4  ;;  %v3890_v9 = vld [vmem:[%s4177_s19 + $0xf8] sm:$0xff]   ;;  %v3907_v41 = vld [vmem:[%s4403_s22 + $0xc0] sm:$0xff]   ;;  %v3909_v4 = vld [vmem:[%s4403_s22 + $0x68] sm:$0xff]  }
 0x24f   : > { %3531 = vmatprep.subr.bf16.mxu0 %v3870_v31  ;;  %v3910_v31 = vld [vmem:[%s4403_s22 + $0x28] sm:$0xff]  }
 0x251   : > { %3518 = vmatpush3.bf16.msra.mxu1 %v3871_v32  ;;  %3532 = vmatpush3.bf16.msra.mxu0 %v3872_v18  ;;  %v3912_v32 = vld [vmem:[%s4403_s22 + $0x88] sm:$0xff]   ;;  %v3913_v18 = vld [vmem:[%s4403_s22 + $0x70] sm:$0xff]  }
 0x252   : > { %3519 = vmatprep.subr.bf16.mxu1 %v3873_v40  ;;  %3533 = vmatprep.subr.bf16.mxu0 %v3874_v7  ;;  %v3916_v40 = vld [vmem:[%s4403_s22 + $0x90] sm:$0xff]   ;;  %v3917_v7 = vld [vmem:[%s4403_s22 + $0x78] sm:$0xff]  }
 0x254   : > { %3732 = vmatmul.mubr.msk.bf16.gmra.mrb[44].mxu0 %vm701_vm3, %v4310_v2  ;;  %v3887_v2 = vld [vmem:[%s4177_s19 + $0xf0] sm:$0xff]  }
 0x255   : > { %3520 = vmatpush3.bf16.msra.mxu1 %v3875_v8  ;;  %3534 = vmatpush3.bf16.msra.mxu0 %v3876_v53  ;;  %v3919_v8 = vld [vmem:[%s4403_s22 + $0xd8] sm:$0xff]  }
 0x256   : > { %2591 = vmatprep.mubr.bf16.mxu0 %v2197_v51  ;;  %3521 = vmatprep.subr.bf16.mxu1 %v3877_v56  ;;  %v3920_v53 = vld [vmem:[%s4403_s22 + $0x98] sm:$0xff]   ;;  %v3923_v56 = vld [vmem:[%s4403_s22 + $0xa0] sm:$0xff]   ;;  %v3927_v51 = vld [vmem:[%s4403_s22 + $0xf0] sm:$0xff]  }
 0x257   : > { %3535 = vmatprep.subr.bf16.mxu0 %v3878_v50  ;;  %v3926_v50 = vld [vmem:[%s4403_s22 + $0xa8] sm:$0xff]  }
 0x259   : > { %3522 = vmatpush3.bf16.msra.mxu1 %v3879_v33  ;;  %3536 = vmatpush3.bf16.msra.mxu0 %v3880_v46  ;;  %v3929_v33 = vld [vmem:[%s4403_s22 + $0xb0] sm:$0xff]   ;;  %v3930_v46 = vld [vmem:[%s4403_s22 + $0xf8] sm:$0xff]  }
 0x25a   : > { %3537 = vmatprep.subr.bf16.mxu0 %v3881_v55  ;;  %3735 = vmatprep.subr.bf16.mxu1 %v3994_v30 }
 0x25c   : > { %2552 = vmatmul.mubr.bf16.vlgmr.msra.gmra.mrb[48].mxu1 %v2194_v14 }
 0x25d   : > { %3538 = vmatpush3.bf16.msra.mxu0 %v3882_v1  ;;  %3736 = vmatpush3.bf16.msra.mxu1 %v3883_v61 }
 0x25e   : > { %3539 = vmatprep.subr.bf16.mxu0 %v3884_v62  ;;  %3737 = vmatprep.subr.bf16.mxu1 %v3994_v30 }
 0x25f   : > { %3751 = vmatprep.mubr.msk.bf16.mxu1 %vm3995_vm6, %v3994_v30 }
 0x261   : > { %3540 = vmatpush3.bf16.msra.mxu0 %v3885_v37  ;;  %3738 = vmatpush3.bf16.msra.mxu1 %v3886_v58 }
 0x262   : > { %3541 = vmatprep.subr.bf16.mxu0 %v3887_v2  ;;  %3739 = vmatprep.subr.bf16.mxu1 %v3994_v30 }
 0x265   : > { %3542 = vmatpush3.bf16.msra.mxu0 %v3888_v49  ;;  %3740 = vmatpush3.bf16.msra.mxu1 %v3889_v34 }
 0x266   : > { %3543 = vmatprep.subr.bf16.mxu0 %v3890_v9  ;;  %3741 = vmatprep.subr.bf16.mxu1 %v3994_v30 }
 0x269   : > { %3544 = vmatpush3.bf16.msra.mxu0 %v3891_v19  ;;  %3742 = vmatpush3.bf16.msra.mxu1 %v3892_v20 }
 0x26a   : > { %3743 = vmatprep.subr.bf16.mxu1 %v3994_v30  ;;  %3560 = vmatprep.subr.bf16.mxu0 %v3897_v26 }
 0x26c   : > { %2592 = vmatmul.mubr.bf16.vlgmr.msra.gmra.mrb[48].mxu0 %v2196_v11 }
 0x26d   : > { %3744 = vmatpush3.bf16.msra.mxu1 %v3893_v52  ;;  %3561 = vmatpush3.bf16.msra.mxu0 %v3898_v27 }
 0x26e   : > { %3745 = vmatprep.subr.bf16.mxu1 %v3994_v30  ;;  %3562 = vmatprep.subr.bf16.mxu0 %v3899_v23 }
 0x271   : > { %3746 = vmatpush3.bf16.msra.mxu1 %v3894_v15  ;;  %3563 = vmatpush3.bf16.msra.mxu0 %v3900_v28 }
 0x272   : > { %3747 = vmatprep.subr.bf16.mxu1 %v3994_v30  ;;  %3564 = vmatprep.subr.bf16.mxu0 %v3901_v24 }
 0x275   : > { %3748 = vmatpush3.bf16.msra.mxu1 %v3895_v44  ;;  %3565 = vmatpush3.bf16.msra.mxu0 %v3902_v43 }
 0x276   : > { %3749 = vmatprep.subr.bf16.mxu1 %v3994_v30  ;;  %3566 = vmatprep.subr.bf16.mxu0 %v3903_v29 }
 0x279   : > { %3750 = vmatpush3.bf16.msra.mxu1 %v3896_v17  ;;  %3567 = vmatpush3.bf16.msra.mxu0 %v3904_v59 }
 0x27a   : > { %3568 = vmatprep.subr.bf16.mxu0 %v3905_v36  ;;  %3582 = vmatprep.subr.bf16.mxu1 %v3907_v41 }
 0x27c   : > { %3752 = vmatmul.mubr.bf16.vlgmr.msra.gmra.mrb[52].mxu1 %v2198_v25 }
 0x27d   : > { %3569 = vmatpush3.bf16.msra.mxu0 %v3906_v47  ;;  %3583 = vmatpush3.bf16.msra.mxu1 %v3908_v3 }
 0x27e   : > { %3570 = vmatprep.subr.bf16.mxu0 %v3909_v4  ;;  %3584 = vmatprep.subr.bf16.mxu1 %v3911_v48 }
 0x281   : > { %3571 = vmatpush3.bf16.msra.mxu0 %v3910_v31  ;;  %3585 = vmatpush3.bf16.msra.mxu1 %v3912_v32 }
 0x282   : > { %3572 = vmatprep.subr.bf16.mxu0 %v3913_v18  ;;  %3586 = vmatprep.subr.bf16.mxu1 %v3915_v39 }
 0x285   : > { %3573 = vmatpush3.bf16.msra.mxu0 %v3914_v35  ;;  %3587 = vmatpush3.bf16.msra.mxu1 %v3916_v40 }
 0x286   : > { %3574 = vmatprep.subr.bf16.mxu0 %v3917_v7  ;;  %3588 = vmatprep.subr.bf16.mxu1 %v3919_v8 }
 0x289   : > { %3575 = vmatpush3.bf16.msra.mxu0 %v3918_v5  ;;  %3589 = vmatpush3.bf16.msra.mxu1 %v3920_v53 }
 0x28a   : > { %3755 = vmatprep.subr.bf16.mxu0 %v3994_v30  ;;  %3590 = vmatprep.subr.bf16.mxu1 %v3921_v42 }
 0x28d   : > { %3591 = vmatpush3.bf16.msra.mxu1 %v3923_v56 }
 0x28e   : > { %3592 = vmatprep.subr.bf16.mxu1 %v3924_v45 }
 0x291   : > { %3593 = vmatpush3.bf16.msra.mxu1 %v3926_v50 }
 0x292   : > { %3594 = vmatprep.subr.bf16.mxu1 %v3927_v51 }
 0x295   : > { %3595 = vmatpush3.bf16.msra.mxu1 %v3929_v33 }
 0x296   : > { %3596 = vmatprep.subr.bf16.mxu1 %v3930_v46 }
 0x299   : > { %3597 = vmatpush3.bf16.msra.mxu1 %v3932_v13 }
 0x2ff   : > { %v3689_v60 = vpop.f32.mrb[24].mxu0  ;;  %v3699_v55 = vpop.f32.mrb[32].mxu1 }
 0x300   : > { %v1571_v1 = vadd.f32 3.0, %v3689_v60  ;;  %v1694_v61 = vadd.f32 3.0, %v3699_v55  ;;  %v1538_v22 = vpop.f32.mrb[25].mxu0  ;;  %v1661_v14 = vpop.f32.mrb[33].mxu1 }
 0x301   : > { %v1569_v62 = vadd.f32 3.0, %v1538_v22  ;;  %v1692_v37 = vadd.f32 3.0, %v1661_v14  ;;  %v3690_v58 = vpop.f32.mrb[26].mxu0  ;;  %v3700_v63 = vpop.f32.mrb[34].mxu1 }
 0x302   : > { %v1579_v0 = vmax.f32 %v1571_v1, 0.0  ;;  %v1702_v2 = vmax.f32 %v1694_v61, 0.0  ;;  %v1572_v49 = vadd.f32 3.0, %v3690_v58  ;;  %v1695_v34 = vadd.f32 3.0, %v3700_v63  ;;  %v1541_v57 = vpop.f32.mrb[27].mxu0  ;;  %v1664_v9 = vpop.f32.mrb[35].mxu1 }
 0x303   : > { %v1577_v6 = vmax.f32 %v1569_v62, 0.0  ;;  %v1700_v19 = vmax.f32 %v1692_v37, 0.0  ;;  %v1570_v20 = vadd.f32 3.0, %v1541_v57  ;;  %v1693_v54 = vadd.f32 3.0, %v1664_v9 }
 0x304   : > { %v1587_v10 = vmin.f32 %v1579_v0, 6.0  ;;  %v1710_v52 = vmin.f32 %v1702_v2, 6.0  ;;  %v1580_v11 = vmax.f32 %v1572_v49, 0.0  ;;  %v1703_v12 = vmax.f32 %v1695_v34, 0.0 }
 0x305   : > { %v1585_v15 = vmin.f32 %v1577_v6, 6.0  ;;  %v1708_v16 = vmin.f32 %v1700_v19, 6.0  ;;  %v1578_v44 = vmax.f32 %v1570_v20, 0.0  ;;  %v1701_v21 = vmax.f32 %v1693_v54, 0.0 }
 0x306   : > { %v1595_v17 = vmul.f32 %v3689_v60, %v1587_v10  ;;  %v1718_v38 = vmul.f32 %v3699_v55, %v1710_v52  ;;  %v1588_v25 = vmin.f32 %v1580_v11, 6.0  ;;  %v1711_v26 = vmin.f32 %v1703_v12, 6.0 }
 0x307   : > { %v1593_v27 = vmul.f32 %v1585_v15, %v1538_v22  ;;  %v1716_v23 = vmul.f32 %v1708_v16, %v1661_v14  ;;  %v1586_v28 = vmin.f32 %v1578_v44, 6.0  ;;  %v1709_v24 = vmin.f32 %v1701_v21, 6.0  ;;  %v3693_v43 = vpop.f32.mrb[28].mxu0  ;;  %v3703_v29 = vpop.f32.mrb[36].mxu1 }
 0x308   : > { %v1603_v59 = vmul.f32 0.16666667, %v1595_v17  ;;  %v1726_v36 = vmul.f32 0.16666667, %v1718_v38  ;;  %v1596_v47 = vmul.f32 %v3690_v58, %v1588_v25  ;;  %v1719_v41 = vmul.f32 %v3700_v63, %v1711_v26  ;;  %v1554_v3 = vpop.f32.mrb[29].mxu0  ;;  %v1677_v4 = vpop.f32.mrb[37].mxu1 }
 0x309   : > { %v1601_v31 = vmul.f32 0.16666667, %v1593_v27  ;;  %v1724_v48 = vmul.f32 0.16666667, %v1716_v23  ;;  %v1594_v32 = vmul.f32 %v1586_v28, %v1541_v57  ;;  %v1717_v18 = vmul.f32 %v1709_v24, %v1664_v9  ;;  %v3694_v35 = vpop.f32.mrb[30].mxu0  ;;  %v3704_v39 = vpop.f32.mrb[38].mxu1 }
 0x30a   : > { %v1604_v40 = vmul.f32 0.16666667, %v1596_v47  ;;  %v1727_v7 = vmul.f32 0.16666667, %v1719_v41  ;;  %v1575_v5 = vadd.f32 3.0, %v3693_v43  ;;  %v1698_v8 = vadd.f32 3.0, %v3703_v29 }
 0x30b   : > { %v1602_v53 = vmul.f32 0.16666667, %v1594_v32  ;;  %v1725_v42 = vmul.f32 0.16666667, %v1717_v18  ;;  %v1573_v56 = vadd.f32 3.0, %v1554_v3  ;;  %v1696_v45 = vadd.f32 3.0, %v1677_v4 }
 0x30c   : > { %v1583_v50 = vmax.f32 %v1575_v5, 0.0  ;;  %v1706_v51 = vmax.f32 %v1698_v8, 0.0  ;;  %v1576_v33 = vadd.f32 3.0, %v3694_v35  ;;  %v1699_v46 = vadd.f32 3.0, %v3704_v39  ;;  %v1557_v13 = vpop.f32.mrb[31].mxu0  ;;  %v1680_v60 = vpop.f32.mrb[39].mxu1 }
 0x30d   : > { %v1610_v55 = vadd.f32 %v1602_v53, %v1601_v31  ;;  %v1733_v1 = vadd.f32 %v1725_v42, %v1724_v48  ;;  %v1581_v61 = vmax.f32 %v1573_v56, 0.0  ;;  %v1704_v22 = vmax.f32 %v1696_v45, 0.0 }
 0x30e   : > { %v1591_v14 = vmin.f32 %v1583_v50, 6.0  ;;  %v1714_v62 = vmin.f32 %v1706_v51, 6.0  ;;  %v1584_v37 = vmax.f32 %v1576_v33, 0.0  ;;  %v1707_v58 = vmax.f32 %v1699_v46, 0.0 }
 0x30f   : > { %v1611_v63 = vadd.f32 %v1610_v55, %v1603_v59  ;;  %v1734_v0 = vadd.f32 %v1733_v1, %v1726_v36  ;;  %v1589_v2 = vmin.f32 %v1581_v61, 6.0  ;;  %v1712_v49 = vmin.f32 %v1704_v22, 6.0  ;;  %v3709_v34 = vpop.f32.mrb[32].mxu0  ;;  %v3719_v57 = vpop.f32.mrb[40].mxu1 }
 0x310   : > { %v1599_v9 = vmul.f32 %v3693_v43, %v1591_v14  ;;  %v1722_v6 = vmul.f32 %v3703_v29, %v1714_v62  ;;  %v1592_v19 = vmin.f32 %v1584_v37, 6.0  ;;  %v1715_v20 = vmin.f32 %v1707_v58, 6.0  ;;  %v1784_v54 = vpop.f32.mrb[33].mxu0  ;;  %v1907_v10 = vpop.f32.mrb[41].mxu1 }
 0x311   : > { %v1597_v52 = vmul.f32 %v1589_v2, %v1554_v3  ;;  %v1612_v11 = vadd.f32 %v1611_v63, %v1604_v40  ;;  %v1720_v12 = vmul.f32 %v1712_v49, %v1677_v4  ;;  %v1735_v15 = vadd.f32 %v1734_v0, %v1727_v7  ;;  %v3710_v16 = vpop.f32.mrb[34].mxu0  ;;  %v3720_v44 = vpop.f32.mrb[42].mxu1 }
 0x312   : > { %v1607_v21 = vmul.f32 0.16666667, %v1599_v9  ;;  %v1730_v17 = vmul.f32 0.16666667, %v1722_v6  ;;  %v1600_v38 = vmul.f32 %v3694_v35, %v1592_v19  ;;  %v4438_v25 = vpop.f32.mrb[35].mxu0  ;;  %v4440_v26 = vpop.f32.mrb[43].mxu1  ;;  %v1723_v29 = vmul.f32 %v3704_v39, %v1715_v20 }
 0x313   : > { %v1605_v27 = vmul.f32 0.16666667, %v1597_v52  ;;  %v1728_v23 = vmul.f32 0.16666667, %v1720_v12  ;;  %v1574_v28 = vadd.f32 3.0, %v1557_v13  ;;  %v1697_v24 = vadd.f32 3.0, %v1680_v60 }
 0x314   : > { %v1608_v43 = vmul.f32 0.16666667, %v1600_v38  ;;  %v1817_v59 = vadd.f32 3.0, %v3709_v34  ;;  %v1940_v36 = vadd.f32 3.0, %v3719_v57  ;;  %v1815_v32 = vadd.f32 3.0, %v1784_v54 }
 0x315   : > { %v1613_v47 = vadd.f32 %v1612_v11, %v1605_v27  ;;  %v1736_v41 = vadd.f32 %v1735_v15, %v1728_v23  ;;  %v1582_v3 = vmax.f32 %v1574_v28, 0.0  ;;  %v1705_v4 = vmax.f32 %v1697_v24, 0.0 }
 0x316   : > { %v1825_v31 = vmax.f32 %v1817_v59, 0.0  ;;  %v1948_v48 = vmax.f32 %v1940_v36, 0.0  ;;  %v1938_v18 = vadd.f32 3.0, %v1907_v10  ;;  %v1818_v7 = vadd.f32 3.0, %v3710_v16 }
 0x317   : > { %v1590_v35 = vmin.f32 %v1582_v3, 6.0  ;;  %v1713_v40 = vmin.f32 %v1705_v4, 6.0  ;;  %v1941_v5 = vadd.f32 3.0, %v3720_v44  ;;  %v4442_v8 = vpop.f32.mrb[36].mxu0  ;;  %v4444_v53 = vpop.f32.mrb[44].mxu1  ;;  %v1823_v56 = vmax.f32 %v1815_v32, 0.0 }
 0x318   : > { %v1833_v42 = vmin.f32 %v1825_v31, 6.0  ;;  %v1956_v39 = vmin.f32 %v1948_v48, 6.0  ;;  %v1946_v45 = vmax.f32 %v1938_v18, 0.0  ;;  %v4446_v50 = vpop.f32.mrb[37].mxu0  ;;  %v4448_v51 = vpop.f32.mrb[45].mxu1  ;;  %v1826_v55 = vmax.f32 %v1818_v7, 0.0 }
 0x319   : > { %v1598_v33 = vmul.f32 %v1590_v35, %v1557_v13  ;;  %v1721_v46 = vmul.f32 %v1713_v40, %v1680_v60  ;;  %v1949_v1 = vmax.f32 %v1941_v5, 0.0  ;;  %v4450_v61 = vpop.f32.mrb[38].mxu0  ;;  %v4452_v22 = vpop.f32.mrb[46].mxu1  ;;  %v1831_v37 = vmin.f32 %v1823_v56, 6.0 }
 0x31a   : > { %v1841_v14 = vmul.f32 %v3709_v34, %v1833_v42  ;;  %v1964_v62 = vmul.f32 %v3719_v57, %v1956_v39  ;;  %v1954_v58 = vmin.f32 %v1946_v45, 6.0  ;;  %v4454_v63 = vpop.f32.mrb[39].mxu0  ;;  %v4456_v0 = vpop.f32.mrb[47].mxu1  ;;  %v1834_v9 = vmin.f32 %v1826_v55, 6.0 }
 0x31b   : > { %v1606_v2 = vmul.f32 0.16666667, %v1598_v33  ;;  %v1729_v49 = vmul.f32 0.16666667, %v1721_v46  ;;  %v1957_v6 = vmin.f32 %v1949_v1, 6.0  ;;  %v1839_v19 = vmul.f32 %v1831_v37, %v1784_v54 }
 0x31c   : > { %v1731_v13 = vmul.f32 0.16666667, %v1723_v29  ;;  %v1849_v60 = vmul.f32 0.16666667, %v1841_v14  ;;  %v1962_v20 = vmul.f32 %v1954_v58, %v1907_v10  ;;  %v1972_v12 = vmul.f32 0.16666667, %v1964_v62 }
 0x31d   : > { %v1614_v52 = vadd.f32 %v1613_v47, %v1606_v2  ;;  %v1737_v11 = vadd.f32 %v1736_v41, %v1729_v49  ;;  %v1842_v15 = vmul.f32 %v3710_v16, %v1834_v9  ;;  %v1847_v34 = vmul.f32 0.16666667, %v1839_v19 }
 0x31e   : > { %v1965_v57 = vmul.f32 %v3720_v44, %v1957_v6  ;;  %v1816_v38 = vadd.f32 3.0, %v4438_v25  ;;  %v1939_v27 = vadd.f32 3.0, %v4440_v26  ;;  %v1970_v24 = vmul.f32 0.16666667, %v1962_v20 }
 0x31f   : > { %v1615_v23 = vadd.f32 %v1614_v52, %v1607_v21  ;;  %v1738_v28 = vadd.f32 %v1737_v11, %v1730_v17  ;;  %v1850_v59 = vmul.f32 0.16666667, %v1842_v15  ;;  %v4460_v36 = vpop.f32.mrb[40].mxu0  ;;  %v1821_v54 = vadd.f32 3.0, %v4442_v8 }
 0x320   : > { %v1824_v29 = vmax.f32 %v1816_v38, 0.0  ;;  %v1947_v3 = vmax.f32 %v1939_v27, 0.0  ;;  %v1944_v10 = vadd.f32 3.0, %v4444_v53  ;;  %v4464_v47 = vpop.f32.mrb[41].mxu0  ;;  %v1819_v41 = vadd.f32 3.0, %v4446_v50 }
 0x321   : > { %v1616_v16 = vadd.f32 %v1615_v23, %v1608_v43  ;;  %v4466_v44 = vadd.f32 %v1738_v28, %v1731_v13  ;;  %v1942_v21 = vadd.f32 3.0, %v4448_v51  ;;  %v4470_v17 = vpop.f32.mrb[42].mxu0  ;;  %v1829_v48 = vmax.f32 %v1821_v54, 0.0 }
 0x322   : > { %v1832_v4 = vmin.f32 %v1824_v29, 6.0  ;;  %v1955_v31 = vmin.f32 %v1947_v3, 6.0  ;;  %v1952_v32 = vmax.f32 %v1944_v10, 0.0  ;;  %v4472_v18 = vpop.f32.mrb[43].mxu0  ;;  %v1973_v40 = vmul.f32 0.16666667, %v1965_v57 }
 0x323   : > { %v2159_v35 = vrot.slane %v1616_v16, 4  ;;  %v1827_v7 = vmax.f32 %v1819_v41, 0.0  ;;  %v1950_v5 = vmax.f32 %v1942_v21, 0.0  ;;  %v1837_v39 = vmin.f32 %v1829_v48, 6.0 }
 0x324   : > { %v1840_v43 = vmul.f32 %v1832_v4, %v4438_v25  ;;  %v1963_v42 = vmul.f32 %v1955_v31, %v4440_v26  ;;  %v1960_v56 = vmin.f32 %v1952_v32, 6.0  ;;  %v1822_v55 = vadd.f32 3.0, %v4450_v61 }
 0x325   : > { %v4476_v45 = vadd.f32 %v2159_v35, %v1616_v16  ;;  %v1835_v33 = vmin.f32 %v1827_v7, 6.0  ;;  %v1958_v46 = vmin.f32 %v1950_v5, 6.0  ;;  %v2165_v1 = vrot.slane %v4466_v44, 4 }
 0x326   : > { %v1848_v14 = vmul.f32 0.16666667, %v1840_v43  ;;  %v1971_v62 = vmul.f32 0.16666667, %v1963_v42  ;;  %v1845_v37 = vmul.f32 %v4442_v8, %v1837_v39  ;;  %v1830_v2 = vmax.f32 %v1822_v55, 0.0 }
 0x327   : > { %v1843_v58 = vmul.f32 %v1835_v33, %v4446_v50  ;;  %v1966_v25 = vmul.f32 %v1958_v46, %v4448_v51  ;;  %v4483_v26 = vpop.f32.mrb[44].mxu0  ;;  %v2161_v49 = vrot.slane %v4476_v45, 2  ;;  %v1968_v13 = vmul.f32 %v4444_v53, %v1960_v56 }
 0x328   : > { %v1856_v9 = vadd.f32 %v1848_v14, %v1847_v34  ;;  %v1979_v6 = vadd.f32 %v1971_v62, %v1970_v24  ;;  %v4487_v19 = vpop.f32.mrb[45].mxu0  ;;  %v1838_v11 = vmin.f32 %v1830_v2, 6.0  ;;  %v1945_v8 = vadd.f32 3.0, %v4452_v22 }
 0x329   : > { %v1851_v20 = vmul.f32 0.16666667, %v1843_v58  ;;  %v1974_v52 = vmul.f32 0.16666667, %v1966_v25  ;;  %v1820_v51 = vadd.f32 3.0, %v4454_v63  ;;  %v1943_v57 = vadd.f32 3.0, %v4456_v0 }
 0x32a   : > { %v1857_v15 = vadd.f32 %v1856_v9, %v1849_v60  ;;  %v1980_v50 = vadd.f32 %v1979_v6, %v1972_v12  ;;  %v4492_v38 = vpop.f32.mrb[46].mxu0  ;;  %v1853_v27 = vmul.f32 0.16666667, %v1845_v37  ;;  %v1953_v34 = vmax.f32 %v1945_v8, 0.0 }
 0x32b   : > { %v2063_v23 = vadd.f32 3.0, %v4460_v36  ;;  %v2061_v53 = vadd.f32 3.0, %v4464_v47  ;;  %v4496_v28 = vpop.f32.mrb[47].mxu0  ;;  %v1828_v3 = vmax.f32 %v1820_v51, 0.0  ;;  %v1951_v54 = vmax.f32 %v1943_v57, 0.0 }
 0x32c   : > { %v1858_v24 = vadd.f32 %v1857_v15, %v1850_v59  ;;  %v1981_v29 = vadd.f32 %v1980_v50, %v1973_v40  ;;  %v1846_v60 = vmul.f32 %v4450_v61, %v1838_v11  ;;  %v1961_v12 = vmin.f32 %v1953_v34, 6.0 }
 0x32d   : > { %v2071_v10 = vmax.f32 %v2063_v23, 0.0  ;;  %v2069_v16 = vmax.f32 %v2061_v53, 0.0  ;;  %v1836_v4 = vmin.f32 %v1828_v3, 6.0  ;;  %v1959_v31 = vmin.f32 %v1951_v54, 6.0 }
 0x32e   : > { %v1859_v41 = vadd.f32 %v1858_v24, %v1851_v20  ;;  %v1982_v21 = vadd.f32 %v1981_v29, %v1974_v52  ;;  %v1969_v48 = vmul.f32 %v4452_v22, %v1961_v12  ;;  %v2064_v7 = vadd.f32 3.0, %v4470_v17 }
 0x32f   : > { %v2079_v32 = vmin.f32 %v2071_v10, 6.0  ;;  %v2077_v35 = vmin.f32 %v2069_v16, 6.0  ;;  %v3523_v5 = vpop.f32.mrb[48].mxu1  ;;  %v1844_v59 = vmul.f32 %v1836_v4, %v4454_v63  ;;  %v1967_v40 = vmul.f32 %v1959_v31, %v4456_v0 }
 0x330   : > { %v2062_v61 = vadd.f32 3.0, %v4472_v18  ;;  %v2067_v43 = vadd.f32 3.0, %v4483_v26  ;;  %v3524_v42 = vpop.f32.mrb[49].mxu1  ;;  %v1976_v39 = vmul.f32 0.16666667, %v1968_v13  ;;  %v2072_v33 = vmax.f32 %v2064_v7, 0.0 }
 0x331   : > { %v1854_v56 = vmul.f32 0.16666667, %v1846_v60  ;;  %v3526_v46 = vpop.f32.mrb[50].mxu1  ;;  %v1852_v55 = vmul.f32 0.16666667, %v1844_v59  ;;  %v2087_v14 = vmul.f32 %v4460_v36, %v2079_v32  ;;  %v2085_v58 = vmul.f32 %v2077_v35, %v4464_v47 }
 0x332   : > { %v1975_v22 = vmul.f32 0.16666667, %v1967_v40  ;;  %v2070_v62 = vmax.f32 %v2062_v61, 0.0  ;;  %v1977_v37 = vmul.f32 0.16666667, %v1969_v48  ;;  %v2080_v63 = vmin.f32 %v2072_v33, 6.0 }
 0x333   : > { %v2065_v0 = vadd.f32 3.0, %v4487_v19  ;;  %v1860_v25 = vadd.f32 %v1859_v41, %v1852_v55  ;;  %v2075_v6 = vmax.f32 %v2067_v43, 0.0  ;;  %v3527_v20 = vpop.f32.mrb[51].mxu1  ;;  %v2068_v11 = vadd.f32 3.0, %v4492_v38 }
 0x334   : > { %v1983_v2 = vadd.f32 %v1982_v21, %v1975_v22  ;;  %v2078_v9 = vmin.f32 %v2070_v62, 6.0  ;;  %v2088_v13 = vmul.f32 %v4470_v17, %v2080_v63  ;;  %v2066_v8 = vadd.f32 3.0, %v4496_v28 }
 0x335   : > { %v2073_v52 = vmax.f32 %v2065_v0, 0.0  ;;  %v1861_v36 = vadd.f32 %v1860_v25, %v1853_v27  ;;  %v2095_v50 = vmul.f32 0.16666667, %v2087_v14  ;;  %v2093_v51 = vmul.f32 0.16666667, %v2085_v58 }
 0x336   : > { %v1984_v15 = vadd.f32 %v1983_v2, %v1976_v39  ;;  %v2086_v47 = vmul.f32 %v2078_v9, %v4472_v18  ;;  %v2076_v34 = vmax.f32 %v2068_v11, 0.0  ;;  %v2074_v23 = vmax.f32 %v2066_v8, 0.0 }
 0x337   : > { %v2081_v57 = vmin.f32 %v2073_v52, 6.0  ;;  %v1862_v53 = vadd.f32 %v1861_v36, %v1854_v56  ;;  %v2083_v3 = vmin.f32 %v2075_v6, 6.0  ;;  %v2096_v54 = vmul.f32 0.16666667, %v2088_v13  ;;  %v3922_v13 = vld [vmem:[%s4403_s22 + $0x100] sm:$0xff]  }
 0x338   : > { %v1985_v24 = vadd.f32 %v1984_v15, %v1977_v37  ;;  %v2094_v29 = vmul.f32 0.16666667, %v2086_v47  ;;  %v2082_v60 = vmin.f32 %v2074_v23, 6.0  ;;  %v2166_v27 = vadd.f32 %v2165_v1, %v4466_v44  ;;  %v3925_v47 = vld [vmem:[%s4403_s22 + $0x108] sm:$0xff]  }
 0x339   : > { %v2089_v17 = vmul.f32 %v2081_v57, %v4487_v19  ;;  %v2171_v12 = vrot.slane %v1862_v53, 4  ;;  %v2162_v18 = vadd.f32 %v2161_v49, %v4476_v45  ;;  %v2084_v21 = vmin.f32 %v2076_v34, 6.0  ;;  %v3928_v34 = vld [vmem:[%s4403_s22 + $0x110] sm:$0xff]  }
 0x33a   : > { %v2177_v10 = vrot.slane %v1985_v24, 4  ;;  %v2102_v16 = vadd.f32 %v2094_v29, %v2093_v51  ;;  %v2090_v4 = vmul.f32 %v2082_v60, %v4496_v28  ;;  %v2167_v31 = vrot.slane %v2166_v27, 2 }
 0x33b   : > { %v2097_v41 = vmul.f32 0.16666667, %v2089_v17  ;;  %v2172_v48 = vadd.f32 %v2171_v12, %v1862_v53  ;;  %v2163_v19 = vrot.slane %v2162_v18, 1  ;;  %v3525_v35 = vadd.f32 %v3524_v42, %v3523_v5 }
 0x33c   : > { %v2103_v32 = vadd.f32 %v2102_v16, %v2095_v50  ;;  %v2091_v7 = vmul.f32 %v4483_v26, %v2083_v3  ;;  %v2168_v59 = vadd.f32 %v2167_v31, %v2166_v27  ;;  %v2178_v44 = vadd.f32 %v2177_v10, %v1985_v24  ;;  %v3931_v3 = vld [vmem:[%s4403_s22 + $0x118] sm:$0xff]   ;;  %v3933_v27 = vld [vmem:[%s4403_s22 + $0x120] sm:$0xff]   ;;  %v3934_v10 = vld [vmem:[%s4403_s22 + $0x128] sm:$0xff]  }
 0x33d   : > { %v2173_v1 = vrot.slane %v2172_v48, 2  ;;  %v2098_v61 = vmul.f32 0.16666667, %v2090_v4  ;;  %v2164_v43 = vadd.f32 %v2163_v19, %v2162_v18  ;;  %v2092_v33 = vmul.f32 %v4492_v38, %v2084_v21  ;;  %v3935_v18 = vld [vmem:[%s4403_s22 + $0x130] sm:$0xff]   ;;  %v3936_v21 = vld [vmem:[%s4403_s22 + $0x138] sm:$0xff]  }
 0x33e   : > { %v2104_v40 = vadd.f32 %v2103_v32, %v2096_v54  ;;  %v2169_v39 = vrot.slane %v2168_v59, 1  ;;  %v2179_v56 = vrot.slane %v2178_v44, 2  ;;  %v2099_v14 = vmul.f32 0.16666667, %v2091_v7 }
 0x33f   : > { %v3545_v45 = vpop.f32.mrb[48].mxu0  ;;  %v2189_v28 = vmul.f32 0.015625, %v2164_v43  ;;  %v2174_v46 = vadd.f32 %v2173_v1, %v2172_v48  ;;  %v2100_v2 = vmul.f32 0.16666667, %v2092_v33 }
 0x340   : > { %v2105_v49 = vadd.f32 %v2104_v40, %v2097_v41  ;;  %v3546_v55 = vpop.f32.mrb[49].mxu0  ;;  %v2170_v22 = vadd.f32 %v2169_v39, %v2168_v59  ;;  %v2180_v5 = vadd.f32 %v2179_v56, %v2178_v44 }
 0x341   : > { %v3547_v26 = vadd.f32 %v3546_v55, %v3545_v45  ;;  %v3548_v42 = vpop.f32.mrb[50].mxu0  ;;  %v2175_v37 = vrot.slane %v2174_v46, 1  ;;  %v2639_v38 = vpack.c.bf16 %v2189_v28, %v2189_v28 }
 0x342   : > { %v2106_v62 = vadd.f32 %v2105_v49, %v2098_v61  ;;  %v3549_v58 = vpop.f32.mrb[51].mxu0  ;;  %v2190_v63 = vmul.f32 0.015625, %v2170_v22  ;;  %v2181_v0 = vrot.slane %v2180_v5, 1 }
 0x343   : > { %v2594_v25 = vadd.f32 %v3547_v26, %v3525_v35  ;;  %v2176_v6 = vadd.f32 %v2175_v37, %v2174_v46 }
 0x344   : > { %v2107_v9 = vadd.f32 %v2106_v62, %v2099_v14  ;;  %v2640_v20 = vpack.c.bf16 %v2190_v63, %v2190_v63  ;;  %v2182_v52 = vadd.f32 %v2181_v0, %v2180_v5 }
 0x345   : > { %v2191_v8 = vmul.f32 0.015625, %v2176_v6 }
 0x346   : > { %v2108_v11 = vadd.f32 %v2107_v9, %v2100_v2  ;;  %2996 = vmatprep.mubr.bf16.mxu0 %v2640_v20  ;;  %v2192_v36 = vmul.f32 0.015625, %v2182_v52 }
 0x347   : > { %2997 = vmatmul.mubr.bf16.vlgmr.msra.gmra.mrb[52].mxu0 %v2639_v38  ;;  %v2641_v50 = vpack.c.bf16 %v2191_v8, %v2191_v8 }
 0x348   : > { %v2183_v15 = vrot.slane %v2108_v11, 4  ;;  %3756 = vmatpush3.bf16.msra.mxu0 %v3922_v13  ;;  %v2642_v51 = vpack.c.bf16 %v2192_v36, %v2192_v36  ;;  %3771 = vmatprep.mubr.msk.bf16.mxu0 %vm3995_vm6, %v3994_v30 }
 0x349   : > { %3757 = vmatprep.subr.bf16.mxu0 %v3994_v30 }
 0x34a   : > { %3036 = vmatprep.mubr.bf16.mxu1 %v2642_v51  ;;  %v2184_v57 = vadd.f32 %v2183_v15, %v2108_v11 }
 0x34b   : > { %3037 = vmatmul.mubr.bf16.vlgmr.msra.gmra.mrb[56].mxu1 %v2641_v50 }
 0x34c   : > { %3758 = vmatpush3.bf16.msra.mxu0 %v3925_v47  ;;  %v2185_v53 = vrot.slane %v2184_v57, 2 }
 0x34d   : > { %3759 = vmatprep.subr.bf16.mxu0 %v3994_v30 }
 0x34e   : > { %v2186_v60 = vadd.f32 %v2185_v53, %v2184_v57 }
 0x34f   : > { %v2633_v23 = vpop.f32.mrb[52].mxu1 }
 0x350   : > { %v2634_v24 = vadd.f32 %v2633_v23, %v2594_v25  ;;  %v3753_v29 = vpop.f32.mrb[53].mxu1  ;;  %3760 = vmatpush3.bf16.msra.mxu0 %v3928_v34  ;;  %v2187_v12 = vrot.slane %v2186_v60, 1 }
 0x351   : > { %v2636_v54 = vpop.f32.mrb[54].mxu1  ;;  %3761 = vmatprep.subr.bf16.mxu0 %v3994_v30 }
 0x352   : > { %3084 = vst [vmem:[%s498_s26] sm:$0x1] %v2634_v24  ;;  %v3754_v17 = vpop.f32.mrb[55].mxu1  ;;  %v2188_v16 = vadd.f32 %v2187_v12, %v2186_v60 }
 0x354   : > { %3762 = vmatpush3.bf16.msra.mxu0 %v3931_v3  ;;  %v2193_v41 = vmul.f32 0.015625, %v2188_v16 }
 0x355   : > { %3763 = vmatprep.subr.bf16.mxu0 %v3994_v30 }
 0x356   : > { %v2643_v4 = vpack.c.bf16 %v2193_v41, %v2193_v41 }
 0x358   : > { %3764 = vmatpush3.bf16.msra.mxu0 %v3933_v27 }
 0x359   : > { %3765 = vmatprep.subr.bf16.mxu0 %v3994_v30 }
 0x35c   : > { %3766 = vmatpush3.bf16.msra.mxu0 %v3934_v10 }
 0x35d   : > { %3767 = vmatprep.subr.bf16.mxu0 %v3994_v30 }
 0x360   : > { %3768 = vmatpush3.bf16.msra.mxu0 %v3935_v18 }
 0x361   : > { %3769 = vmatprep.subr.bf16.mxu0 %v3994_v30 }
 0x364   : > { %3770 = vmatpush3.bf16.msra.mxu0 %v3936_v21 }
 0x367   : > { %3772 = vmatmul.mubr.bf16.vlgmr.msra.gmra.mrb[56].mxu0 %v2643_v4 }
 0x41a   : > { %v3576_v31 = vpop.f32.mrb[52].mxu0 }
 0x41b   : > { %v3577_v48 = vpop.f32.mrb[53].mxu0 }
 0x41c   : > { %v3578_v32 = vadd.f32 %v3577_v48, %v3576_v31  ;;  %v3579_v19 = vpop.f32.mrb[54].mxu0 }
 0x41d   : > { %v3580_v35 = vpop.f32.mrb[55].mxu0 }
 0x41e   : > { %v3598_v7 = vpop.f32.mrb[56].mxu1 }
 0x41f   : > { %v3599_v59 = vpop.f32.mrb[57].mxu1 }
 0x420   : > { %v3600_v44 = vadd.f32 %v3599_v59, %v3598_v7  ;;  %v3601_v1 = vpop.f32.mrb[58].mxu1 }
 0x421   : > { %v3602_v40 = vpop.f32.mrb[59].mxu1 }
 0x422   : > { %v3039_v61 = vadd.f32 %v3600_v44, %v3578_v32 }
 0x43a   : > { %v3078_v43 = vpop.f32.mrb[56].mxu0 }
 0x43b   : > { %v3079_v30 = vadd.f32 %v3078_v43, %v3039_v61  ;;  %v3773_v39 = vpop.f32.mrb[57].mxu0 }
 0x43c   : > { %v3081_v56 = vpop.f32.mrb[58].mxu0 }
 0x43d   : > { %3085 = vst [vmem:[%s505_s14] sm:$0x1] %v3079_v30  ;;  %v3774_v45 = vpop.f32.mrb[59].mxu0 }
 0x43e PF: > { %s19_s11 = sadd.s32 1, %s3991_s11   ;;  %s4582_s27 = smov %s3971_s28 }
 0x43f   : > { %p16_p13 = scmp.ge.s32.totalorder %s19_s11, 6   ;;  %s4583_s28 = smov %s4090_s16 }
 0x440   : > { %s4584_s29 = smov %s3983_s9  ;;  %s4585_s30 = smov %s3987_s10 }
 0x441   : > { %s4586_s9 = smov %s4589_s12  ;;  %s4587_s10 = smov %s4593_s13 }
 0x442   :  { %18 = sbr.rel (!%p16_p13) target bundleno = 4 (0x4), region = 147 }

</bundles_post_ra>
